<compile_context>
chip_gen: v7x
topology: tpu7x:2x2x1
jax: 0.10.0
libtpu: 0.0.40
codegen_flags: <defaults>
</compile_context>

<pallas_src>
import jax
import jax.numpy as jnp
import numpy as np
from jax.experimental import pallas as pl
from jax.experimental.pallas import tpu as pltpu


# ----------------------------------------------------------------------------
# Kernel
# ----------------------------------------------------------------------------
def _gumbel_vq_kernel(x_ref, w1_ref, b1_ref, w2_ref, b2_ref, cbt_ref,
                      out_ref, idx_ref):
    # x_ref:   (1, D, tn)  input tile (embedding dim on sublanes, tokens on lanes)
    # w1_ref:  (C, D)      first Linear weight (PyTorch (out, in) layout)
    # b1_ref:  (C, 1)      first bias (f32)
    # w2_ref:  (C, C)      second Linear weight
    # b2_ref:  (C, 1)      second bias (f32)
    # cbt_ref: (D, C)      codebook, pre-transposed in the wrapper (f32)
    # out_ref: (1, D, tn)  quantized embeddings (lane-dense)
    # idx_ref: (1, 1, tn)  argmax indices (lane-dense)
    x = x_ref[0]                                                        # (D, tn)

    # proj: Linear(D -> C) + ReLU + Linear(C -> C), in (C, tn) orientation.
    h = jnp.dot(w1_ref[...], x, preferred_element_type=jnp.float32) + b1_ref[...]
    h = jnp.maximum(h, 0.0).astype(w2_ref.dtype)        # match W2 dtype (bf16/f32)
    logit = (jnp.dot(w2_ref[...], h, preferred_element_type=jnp.float32)
             + b2_ref[...])                                             # (C, tn) f32

    # Hard (eval-mode) quantization: first-maximal argmax over the codebook
    # (sublane) axis.  The iota is a (C, 1) column; broadcasting inside the
    # compares avoids materializing a full (C, tn) int32 iota.
    c = logit.shape[0]
    col = jax.lax.broadcasted_iota(jnp.int32, (c, 1), 0)                # (C, 1)
    m = jnp.max(logit, axis=0, keepdims=True)                           # (1, tn)
    idx = jnp.min(jnp.where(logit == m, col, c), axis=0, keepdims=True) # (1, tn)
    onehot = (col == idx).astype(cbt_ref.dtype)                         # (C, tn)

    # Codebook lookup as one-hot matmul (kept in f32): (D, C) @ (C, tn).
    out_ref[0] = jnp.dot(cbt_ref[...], onehot,
                         preferred_element_type=jnp.float32).astype(out_ref.dtype)
    idx_ref[0] = idx


# ----------------------------------------------------------------------------
# Tile / VMEM policy
# ----------------------------------------------------------------------------
def _vmem_limit_bytes():
    """Generation-aware scoped-VMEM target."""
    phys = None
    try:
        info = pltpu.get_tpu_info()
        phys = getattr(info, "vmem_capacity_bytes", None)
    except Exception:  # pragma: no cover - conservative fallback
        phys = None
    if phys is None:
        phys = 64 * 1024 * 1024                 # assume v7x-sized VMEM
    if phys >= 100 * 1024 * 1024:               # v5e / v6e: 128 MiB physical
        return 96 * 1024 * 1024
    return 48 * 1024 * 1024                     # v7x: stay well under 64 MiB


def _weight_vmem_bytes(C, D, in_itemsize):
    # W1, W2 in the matmul dtype; biases + codebook^T in f32.  Budget assumes 2
    # buffers to keep headroom even though Buffered(1) is requested.
    return 2 * (C * D * in_itemsize + C * C * in_itemsize
                + 2 * C * 4 + D * C * 4)


def _largest_divisor_tile(n128, cap):
    """Largest multiple of 128 that divides n128 and is <= cap."""
    cap = max(128, min(cap, n128))
    t = (cap // 128) * 128
    while t > 128:
        if n128 % t == 0:
            return t
        t -= 128
    return 128


def _pick_token_tile(N, B, D, C, in_itemsize, vmem_limit, max_tile):
    """Return (padded token count, token tile) -- both multiples of 128."""
    n128 = ((max(N, 1) + 127) // 128) * 128
    # Per-token VMEM: double-buffered x & out tiles, idx tile (padded to 8
    # sublanes), plus ~3 f32 (C,) intermediates per lane (h, logit, onehot).
    per_token = 2 * D * in_itemsize + 2 * D * 4 + 2 * 8 * 4 + 3 * C * 4
    budget = int(0.7 * vmem_limit) - _weight_vmem_bytes(C, D, in_itemsize)
    cap = max(128, min(max_tile, budget // max(per_token, 1)))
    if B == 1 and n128 >= 256:
        cap = min(cap, n128 // 2)   # >= 2 grid steps so both v7x TCs get work
    return n128, _largest_divisor_tile(n128, cap)


# ----------------------------------------------------------------------------
# Wrapper
# ----------------------------------------------------------------------------
def gumbel_vq_forward(x, w1, b1, w2, b2, codebook, *,
                      use_bf16_matmul=False, max_tile=4096):
    """Forward pass of GumbelVectorQuantizer (eval mode).

    Args:
      x: (batch, embedding_dim, *spatial) float32     -- PyTorch NCHW-like layout
      w1: (codebook_size, embedding_dim)              -- nn.Linear weight (out, in)
      b1: (codebook_size,)
      w2: (codebook_size, codebook_size)
      b2: (codebook_size,)
      codebook: (codebook_size, embedding_dim)
      use_bf16_matmul: cast x / W1 / W2 to bf16 for the projection matmuls
        (faster; argmax may flip on near-ties vs. the f32 reference).

    Returns:
      output:  (batch, embedding_dim, *spatial) float32
      indices: (batch, *spatial) int32
    """
    B, D = x.shape[0], x.shape[1]
    spatial = x.shape[2:]
    N = int(np.prod(spatial)) if spatial else 1
    C = codebook.shape[0]

    in_dtype = jnp.bfloat16 if use_bf16_matmul else jnp.float32
    in_itemsize = 2 if use_bf16_matmul else 4

    vmem_limit = _vmem_limit_bytes()
    if _weight_vmem_bytes(C, D, in_itemsize) > int(0.6 * vmem_limit):
        # TODO(synk): C-tiled W2 with running (max, argmax) accumulator for
        # very large codebooks (needed once 4*C^2 approaches the VMEM budget).
        raise NotImplementedError(
            "codebook_size too large for fully-resident W2 on this TPU "
            "generation; C-tiled argmax path not implemented")

    n_pad, tn = _pick_token_tile(N, B, D, C, in_itemsize, vmem_limit, max_tile)

    # Contiguous reshape + lane-axis zero pad only; no activation transpose.
    xr = x.reshape(B, D, N).astype(in_dtype)
    if n_pad > N:
        xr = jnp.pad(xr, ((0, 0), (0, 0), (0, n_pad - N)))

    w1c = w1.astype(in_dtype)
    w2c = w2.astype(in_dtype)
    b1r = b1.reshape(C, 1).astype(jnp.float32)
    b2r = b2.reshape(C, 1).astype(jnp.float32)
    cbt = jnp.transpose(codebook).astype(jnp.float32)   # (D, C): tiny param transpose

    gj = n_pad // tn

    def _const_spec(shape):
        # Grid-invariant weight block: single buffer is enough.
        return pl.BlockSpec(shape, lambda b, j: (0, 0),
                            pipeline_mode=pl.Buffered(1))

    out, idx = pl.pallas_call(
        _gumbel_vq_kernel,
        out_shape=(
            jax.ShapeDtypeStruct((B, D, n_pad), jnp.float32),
            jax.ShapeDtypeStruct((B, 1, n_pad), jnp.int32),
        ),
        grid_spec=pltpu.PrefetchScalarGridSpec(
            num_scalar_prefetch=0,
            grid=(B, gj),
            in_specs=[
                pl.BlockSpec((1, D, tn), lambda b, j: (b, 0, j)),   # x tile
                _const_spec((C, D)),                                # W1
                _const_spec((C, 1)),                                # b1
                _const_spec((C, C)),                                # W2
                _const_spec((C, 1)),                                # b2
                _const_spec((D, C)),                                # codebook^T
            ],
            out_specs=[
                pl.BlockSpec((1, D, tn), lambda b, j: (b, 0, j)),   # embeddings
                pl.BlockSpec((1, 1, tn), lambda b, j: (b, 0, j)),   # indices
            ],
        ),
        compiler_params=pltpu.CompilerParams(
            dimension_semantics=("parallel", "parallel"),
            vmem_limit_bytes=vmem_limit,
        ),
    )(xr, w1c, b1r, w2c, b2r, cbt)

    if n_pad > N:
        out = out[:, :, :N]
        idx = idx[:, :, :N]
    output = out.reshape(B, D, *spatial)          # contiguous reshape only
    indices = idx.reshape(B, *spatial)
    return output, indices


# ----------------------------------------------------------------------------
# Reference + checks
# ----------------------------------------------------------------------------
def _reference_forward(x, w1, b1, w2, b2, codebook):
    """Pure-JAX reference matching the PyTorch forward (eval path)."""
    B, D = x.shape[0], x.shape[1]
    spatial = x.shape[2:]
    N = int(np.prod(spatial)) if spatial else 1
    xt = jnp.transpose(x.reshape(B, D, N), (0, 2, 1))           # (B, N, D)
    h = jnp.maximum(xt @ w1.T + b1, 0.0)
    logit = h @ w2.T + b2                                        # (B, N, C)
    idx = jnp.argmax(logit, axis=-1)                             # (B, N)
    out = codebook[idx]                                          # (B, N, D)
    out = jnp.transpose(out, (0, 2, 1)).reshape(B, D, *spatial)
    return out, idx.reshape(B, *spatial).astype(jnp.int32)


def _check_lookup_consistency(out, idx, codebook):
    """output must equal codebook[idx] computed from the kernel's own indices."""
    out_np = np.asarray(out)
    idx_np = np.asarray(idx)
    cb = np.asarray(codebook)
    B, D = out_np.shape[0], out_np.shape[1]
    out_flat = out_np.reshape(B, D, -1)
    idx_flat = idx_np.reshape(B, -1)
    gathered = np.transpose(cb[idx_flat], (0, 2, 1))             # (B, D, N)
    np.testing.assert_allclose(out_flat, gathered, rtol=1e-5, atol=1e-5)


def _check(out, idx, ref_out, ref_idx, codebook, min_agree=0.99):
    _check_lookup_consistency(out, idx, codebook)
    out_np, idx_np = np.asarray(out), np.asarray(idx)
    ref_out_np, ref_idx_np = np.asarray(ref_out), np.asarray(ref_idx)
    B, D = out_np.shape[0], out_np.shape[1]
    agree = idx_np.reshape(B, -1) == ref_idx_np.reshape(B, -1)
    frac = float(np.mean(agree))
    # Tolerate (extremely rare) near-tie argmax flips from differing
    # accumulation order on the MXU vs. the XLA reference matmul.
    assert frac >= min_agree, f"index agreement {frac:.4f} < {min_agree}"
    o = np.transpose(out_np.reshape(B, D, -1), (0, 2, 1))[agree]
    r = np.transpose(ref_out_np.reshape(B, D, -1), (0, 2, 1))[agree]
    np.testing.assert_allclose(o, r, rtol=1e-5, atol=1e-5)


# ----------------------------------------------------------------------------
# Demo / smoke test
# ----------------------------------------------------------------------------
if __name__ == "__main__":
    batch_size = 2
    embedding_dim = 32
    codebook_size = 128
    spatial = (16, 16)          # input: (2, 32, 16, 16) -> 256 tokens per batch

    key = jax.random.PRNGKey(0)
    kx, k1, k2, k3, k4, k5 = jax.random.split(key, 6)

    x = jax.random.normal(kx, (batch_size, embedding_dim, *spatial), jnp.float32)

    # Deterministic synthetic parameters (shapes follow the module __init__).
    w1 = 0.1 * jax.random.normal(k1, (codebook_size, embedding_dim), jnp.float32)
    b1 = 0.01 * jax.random.normal(k2, (codebook_size,), jnp.float32)
    w2 = 0.1 * jax.random.normal(k3, (codebook_size, codebook_size), jnp.float32)
    b2 = 0.01 * jax.random.normal(k4, (codebook_size,), jnp.float32)
    codebook = jax.random.normal(k5, (codebook_size, embedding_dim), jnp.float32)

    # --- f32 path vs. reference -------------------------------------------
    out, idx = gumbel_vq_forward(x, w1, b1, w2, b2, codebook)
    out = jax.block_until_ready(out)
    idx = jax.block_until_ready(idx)
    ref_out, ref_idx = _reference_forward(x, w1, b1, w2, b2, codebook)
    _check(out, idx, ref_out, ref_idx, codebook)
    assert out.shape == (batch_size, embedding_dim, *spatial)
    assert idx.shape == (batch_size, *spatial)

    # --- non-128-multiple spatial grid + batch=1 (exercises padding path) --
    x_odd = jax.random.normal(kx, (1, embedding_dim, 7, 9), jnp.float32)
    out_odd, idx_odd = gumbel_vq_forward(x_odd, w1, b1, w2, b2, codebook)
    out_odd = jax.block_until_ready(out_odd)
    ref_out_odd, ref_idx_odd = _reference_forward(x_odd, w1, b1, w2, b2, codebook)
    _check(out_odd, idx_odd, ref_out_odd, ref_idx_odd, codebook)
    assert out_odd.shape == (1, embedding_dim, 7, 9)
    assert idx_odd.shape == (1, 7, 9)

    # --- bf16 projection matmuls (opt-in fast path) -------------------------
    # Only self-consistency is asserted: argmax may legitimately differ from
    # the f32 reference on near-ties.
    out_bf, idx_bf = gumbel_vq_forward(x, w1, b1, w2, b2, codebook,
                                       use_bf16_matmul=True)
    out_bf = jax.block_until_ready(out_bf)
    idx_bf = jax.block_until_ready(idx_bf)
    assert out_bf.shape == out.shape and idx_bf.shape == idx.shape
    _check_lookup_consistency(out_bf, idx_bf, codebook)

    print("KERNEL_OK")
</pallas_src>

<mosaic_0001>
module attributes {stable_mosaic.version = 11 : i64} {
  func.func @_gumbel_vq_kernel(%arg0: i32, %arg1: i32, %arg2: memref<1x32x256xf32, #tpu.memory_space<vmem>>, %arg3: memref<128x32xf32, #tpu.memory_space<vmem>>, %arg4: memref<128x1xf32, #tpu.memory_space<vmem>>, %arg5: memref<128x128xf32, #tpu.memory_space<vmem>>, %arg6: memref<128x1xf32, #tpu.memory_space<vmem>>, %arg7: memref<32x128xf32, #tpu.memory_space<vmem>>, %arg8: memref<1x32x256xf32, #tpu.memory_space<vmem>>, %arg9: memref<1x1x256xi32, #tpu.memory_space<vmem>>) attributes {dimension_semantics = [#tpu.dimension_semantics<parallel>, #tpu.dimension_semantics<parallel>], iteration_bounds = array<i64: 2, 1>, scalar_prefetch = 0 : i64, scratch_operands = 0 : i64, tpu.core_type = #tpu.core_type<tc>, window_params = [{transform_indices = @transform_0, window_bounds = array<i64: 1, 32, 256>}, {pipeline_mode = #tpu.pipeline_mode<synchronous>, transform_indices = @transform_1, window_bounds = array<i64: 128, 32>}, {pipeline_mode = #tpu.pipeline_mode<synchronous>, transform_indices = @transform_2, window_bounds = array<i64: 128, 1>}, {pipeline_mode = #tpu.pipeline_mode<synchronous>, transform_indices = @transform_3, window_bounds = array<i64: 128, 128>}, {pipeline_mode = #tpu.pipeline_mode<synchronous>, transform_indices = @transform_4, window_bounds = array<i64: 128, 1>}, {pipeline_mode = #tpu.pipeline_mode<synchronous>, transform_indices = @transform_5, window_bounds = array<i64: 32, 128>}, {transform_indices = @transform_6, window_bounds = array<i64: 1, 32, 256>}, {transform_indices = @transform_7, window_bounds = array<i64: 1, 1, 256>}]} {
    %c0 = arith.constant 0 : index
    %c0_0 = arith.constant 0 : index
    %c0_1 = arith.constant 0 : index
    %0 = vector.load %arg2[%c0, %c0_0, %c0_1] : memref<1x32x256xf32, #tpu.memory_space<vmem>>, vector<1x32x256xf32>
    %1 = vector.shape_cast %0 : vector<1x32x256xf32> to vector<32x256xf32>
    %c0_2 = arith.constant 0 : index
    %c0_3 = arith.constant 0 : index
    %2 = vector.load %arg3[%c0_2, %c0_3] : memref<128x32xf32, #tpu.memory_space<vmem>>, vector<128x32xf32>
    %cst = arith.constant dense<0.000000e+00> : vector<128x256xf32>
    %3 = tpu.matmul %2, %1, %cst {dimension_numbers = #tpu.dot_dimension_numbers<[1], [0], [0], [1], [0, 0, 1, 1], [], []>} : vector<128x32xf32>, vector<32x256xf32>, vector<128x256xf32> -> vector<128x256xf32>
    %c0_4 = arith.constant 0 : index
    %c0_5 = arith.constant 0 : index
    %4 = vector.load %arg4[%c0_4, %c0_5] : memref<128x1xf32, #tpu.memory_space<vmem>>, vector<128x1xf32>
    %5 = vector.broadcast %4 : vector<128x1xf32> to vector<128x256xf32>
    %6 = arith.addf %3, %5 : vector<128x256xf32>
    %cst_6 = arith.constant 0.000000e+00 : f32
    %7 = vector.broadcast %cst_6 : f32 to vector<128x256xf32>
    %8 = arith.maximumf %6, %7 : vector<128x256xf32>
    %c0_7 = arith.constant 0 : index
    %c0_8 = arith.constant 0 : index
    %9 = vector.load %arg5[%c0_7, %c0_8] : memref<128x128xf32, #tpu.memory_space<vmem>>, vector<128x128xf32>
    %cst_9 = arith.constant dense<0.000000e+00> : vector<128x256xf32>
    %10 = tpu.matmul %9, %8, %cst_9 {dimension_numbers = #tpu.dot_dimension_numbers<[1], [0], [0], [1], [0, 0, 1, 1], [], []>} : vector<128x128xf32>, vector<128x256xf32>, vector<128x256xf32> -> vector<128x256xf32>
    %c0_10 = arith.constant 0 : index
    %c0_11 = arith.constant 0 : index
    %11 = vector.load %arg6[%c0_10, %c0_11] : memref<128x1xf32, #tpu.memory_space<vmem>>, vector<128x1xf32>
    %12 = vector.broadcast %11 : vector<128x1xf32> to vector<128x256xf32>
    %13 = arith.addf %10, %12 : vector<128x256xf32>
    %14 = tpu.iota {dimensions = array<i32: 0>} : vector<128x1xi32>
    %cst_12 = arith.constant dense<0xFF800000> : vector<256xf32>
    %15 = vector.multi_reduction <maximumf>, %13, %cst_12 [0] : vector<128x256xf32> to vector<256xf32>
    %16 = vector.shape_cast %15 : vector<256xf32> to vector<1x256xf32>
    %17 = vector.broadcast %16 : vector<1x256xf32> to vector<128x256xf32>
    %18 = arith.cmpf oeq, %13, %17 : vector<128x256xf32>
    %c128_i32 = arith.constant 128 : i32
    %19 = vector.shape_cast %14 : vector<128x1xi32> to vector<128x1xi32>
    %20 = vector.broadcast %19 : vector<128x1xi32> to vector<128x256xi32>
    %21 = vector.broadcast %c128_i32 : i32 to vector<128x256xi32>
    %22 = arith.select %18, %20, %21 : vector<128x256xi1>, vector<128x256xi32>
    %cst_13 = arith.constant dense<2147483647> : vector<256xi32>
    %23 = vector.multi_reduction <minsi>, %22, %cst_13 [0] : vector<128x256xi32> to vector<256xi32>
    %24 = vector.shape_cast %23 : vector<256xi32> to vector<1x256xi32>
    %25 = vector.broadcast %14 : vector<128x1xi32> to vector<128x256xi32>
    %26 = vector.broadcast %24 : vector<1x256xi32> to vector<128x256xi32>
    %27 = arith.cmpi eq, %25, %26 : vector<128x256xi32>
    %28 = arith.extui %27 : vector<128x256xi1> to vector<128x256xi32>
    %29 = arith.sitofp %28 : vector<128x256xi32> to vector<128x256xf32>
    %c0_14 = arith.constant 0 : index
    %c0_15 = arith.constant 0 : index
    %30 = vector.load %arg7[%c0_14, %c0_15] : memref<32x128xf32, #tpu.memory_space<vmem>>, vector<32x128xf32>
    %cst_16 = arith.constant dense<0.000000e+00> : vector<32x256xf32>
    %31 = tpu.matmul %30, %29, %cst_16 {dimension_numbers = #tpu.dot_dimension_numbers<[1], [0], [0], [1], [0, 0, 1, 1], [], []>} : vector<32x128xf32>, vector<128x256xf32>, vector<32x256xf32> -> vector<32x256xf32>
    %c0_17 = arith.constant 0 : index
    %c0_18 = arith.constant 0 : index
    %c0_19 = arith.constant 0 : index
    %32 = vector.load %arg8[%c0_17, %c0_18, %c0_19] : memref<1x32x256xf32, #tpu.memory_space<vmem>>, vector<1x32x256xf32>
    %33 = vector.shape_cast %32 : vector<1x32x256xf32> to vector<32x256xf32>
    %34 = vector.shape_cast %31 : vector<32x256xf32> to vector<1x32x256xf32>
    tpu.vector_store %arg8[%c0_17, %c0_18, %c0_19], %34 {strides = array<i32>} : memref<1x32x256xf32, #tpu.memory_space<vmem>>, vector<1x32x256xf32>,
    %c0_20 = arith.constant 0 : index
    %c0_21 = arith.constant 0 : index
    %c0_22 = arith.constant 0 : index
    %35 = vector.load %arg9[%c0_20, %c0_21, %c0_22] : memref<1x1x256xi32, #tpu.memory_space<vmem>>, vector<1x1x256xi32>
    %36 = vector.shape_cast %35 : vector<1x1x256xi32> to vector<1x256xi32>
    %37 = vector.shape_cast %24 : vector<1x256xi32> to vector<1x1x256xi32>
    tpu.vector_store %arg9[%c0_20, %c0_21, %c0_22], %37 {strides = array<i32>} : memref<1x1x256xi32, #tpu.memory_space<vmem>>, vector<1x1x256xi32>,
    return
  }
  func.func @transform_0(%arg0: i32, %arg1: i32) -> (i32, i32, i32) {
    %c0_i32 = arith.constant 0 : i32
    %c0_i32_0 = arith.constant 0 : i32
    return %arg0, %c0_i32, %arg1 : i32, i32, i32
  }
  func.func @transform_1(%arg0: i32, %arg1: i32) -> (i32, i32) {
    %c0_i32 = arith.constant 0 : i32
    %c0_i32_0 = arith.constant 0 : i32
    %c0_i32_1 = arith.constant 0 : i32
    return %c0_i32, %c0_i32_0 : i32, i32
  }
  func.func @transform_2(%arg0: i32, %arg1: i32) -> (i32, i32) {
    %c0_i32 = arith.constant 0 : i32
    %c0_i32_0 = arith.constant 0 : i32
    %c0_i32_1 = arith.constant 0 : i32
    return %c0_i32, %c0_i32_0 : i32, i32
  }
  func.func @transform_3(%arg0: i32, %arg1: i32) -> (i32, i32) {
    %c0_i32 = arith.constant 0 : i32
    %c0_i32_0 = arith.constant 0 : i32
    %c0_i32_1 = arith.constant 0 : i32
    return %c0_i32, %c0_i32_0 : i32, i32
  }
  func.func @transform_4(%arg0: i32, %arg1: i32) -> (i32, i32) {
    %c0_i32 = arith.constant 0 : i32
    %c0_i32_0 = arith.constant 0 : i32
    %c0_i32_1 = arith.constant 0 : i32
    return %c0_i32, %c0_i32_0 : i32, i32
  }
  func.func @transform_5(%arg0: i32, %arg1: i32) -> (i32, i32) {
    %c0_i32 = arith.constant 0 : i32
    %c0_i32_0 = arith.constant 0 : i32
    %c0_i32_1 = arith.constant 0 : i32
    return %c0_i32, %c0_i32_0 : i32, i32
  }
  func.func @transform_6(%arg0: i32, %arg1: i32) -> (i32, i32, i32) {
    %c0_i32 = arith.constant 0 : i32
    %c0_i32_0 = arith.constant 0 : i32
    return %arg0, %c0_i32, %arg1 : i32, i32, i32
  }
  func.func @transform_7(%arg0: i32, %arg1: i32) -> (i32, i32, i32) {
    %c0_i32 = arith.constant 0 : i32
    %c0_i32_0 = arith.constant 0 : i32
    return %arg0, %c0_i32, %arg1 : i32, i32, i32
  }
}

</mosaic_0001>

<bundles_post_ra>
// kernel: tpu_custom_call.1
= control target key start
LH: loop header
LB: loop body
LE: loop exit
PB: predicated region body
PF: predicated region fallthrough
CT: control target
= control target key end

     0   :  { %13 = vsyncpa [#allocation3], 0  ;;  %s2757_s0 = inlined_call_operand.vmem [shape: f32[2,32,256], index: 0, kind: input, shape index: {}]   ;;  %s2758_s1 = inlined_call_operand.vmem [shape: f32[128,32], index: 1, kind: input, shape index: {}]   ;;  %s2759_s2 = inlined_call_operand.vmem [shape: f32[128,1], index: 2, kind: input, shape index: {}]   ;;  %s2760_s3 = inlined_call_operand.vmem [shape: f32[128,128], index: 3, kind: input, shape index: {}]   ;;  %s2761_s4 = inlined_call_operand.vmem [shape: f32[128,1], index: 4, kind: input, shape index: {}]   ;;  %s2762_s5 = inlined_call_operand.vmem [shape: f32[32,128], index: 5, kind: input, shape index: {}]   ;;  %s2763_s6 = inlined_call_operand.hbm [shape: f32[2,32,256], index: 6, kind: output, shape index: {0}]   ;;  %s2764_s7 = inlined_call_operand.hbm [shape: s32[2,1,256], index: 7, kind: output, shape index: {1}]  }
   0x1   :  { %15 = vsyncpa [#allocation3 + $0x1], 0 }
   0x2   :  { %16 = vsyncpa [#allocation5], 0 }
   0x3   :  { %18 = vsyncpa [#allocation5 + $0x1], 0  ;;  %s1926_s24 = smov 0   ;;  %s1928_s25 = smov 0  }
   0x4   :  { %s1930_s26 = smov 0   ;;  %s1932_s27 = smov 0  }
   0x5   :  { %s1934_s28 = smov 0   ;;  %s1936_s29 = smov 0  }
   0x6 LB: > { %s1526_s30 = sadd.s32 4294967295, %s1876_s29   ;;  %s1527_s8 = sadd.s32 4294967294, %s1876_s29   ;;  %s1876_s29 = sphi %s1936_s29, %s24_s29   ;;  %s1872_s28 = sphi %s1934_s28, %s2779_s28   ;;  %s1868_s27 = sphi %s1932_s27, %s2778_s27   ;;  %s1864_s26 = sphi %s1930_s26, %s2777_s26   ;;  %s1860_s25 = sphi %s1928_s25, %s2776_s25   ;;  %s1856_s24 = sphi %s1926_s24, %s2775_s24  }
   0x7   : > { %s36_s9 = sadd.s32 1, %s1872_s28  ;;  %s178_s10 = sadd.s32 1, %s1864_s26 }
   0x8   : > { %p38_p0 = scmp.ge.s32.totalorder %s36_s9, 2  ;;  %p188_p1 = scmp.ne.s32.totalorder %s1864_s26, %s1860_s25 }
   0x9   : > { %p189_p2 = scmp.eq.s32.totalorder %s1526_s30, 1  ;;  %p194_p3 = scmp.ne.s32.totalorder %s1860_s25, %s1856_s24 }
   0xa   : > { %s2781_s9 = smov (%p38_p0, %s36_s9), 0  ;;  %p195_p5 = scmp.eq.s32.totalorder %s1527_s8, 1 }
   0xb   : > { %p1966_p4 = por %p189_p2, %p188_p1  ;;  %s173_s12 = ssub.s32 %s1872_s28, %s2781_s9 }
   0xc   : > { %p1530_p6 = scmp.ge.s32.totalorder %s1876_s29, 1  ;;  %p176_p7 = scmp.eq.s32.totalorder %s173_s12, 0 }
   0xd   : > { %p1973_p8 = por %p195_p5, %p194_p3  ;;  %p269_p9 = scmp.lt.s32.totalorder %s1876_s29, 3 }
   0xe   : > { %s1979_s14 = scalar_select %p176_p7, %s1864_s26, %s178_s10  }
   0xf   : > { %p270_p10 = pnand %p1530_p6, %p269_p9 }
  0x10   : > { %p311_p11 = scmp.lt.s32.totalorder (!%p270_p10), %s1868_s27, 1  ;;  %v1878_v0 = vmov (!%p270_p10), 0.0   ;;  %v1879_v1 = vmov (!%p270_p10), 0   ;;  %v346_v2 = vld [vmem:[%s2759_s2] sm:$0xff] (!%p270_p10)  ;;  %v348_v3 = vld [vmem:[%s2759_s2 + $0x10] sm:$0xff] (!%p270_p10)  ;;  %v347_v4 = vld [vmem:[%s2759_s2 + $0x8] sm:$0xff] (!%p270_p10) }
  0x11   : > { %273 = sbr.rel (%p270_p10) target bundleno = 934 (0x3a6), region = 44  ;;  %555 = vmatprep.mubr.f32.mxu0 (!%p270_p10), %v1878_v0  ;;  %860 = vmatprep.mubr.f32.mxu1 (!%p270_p10), %v1878_v0  ;;  %v349_v16 = vld [vmem:[%s2759_s2 + $0x18] sm:$0xff] (!%p270_p10)  ;;  %v350_v18 = vld [vmem:[%s2759_s2 + $0x20] sm:$0xff] (!%p270_p10)  ;;  %v351_v19 = vld [vmem:[%s2759_s2 + $0x28] sm:$0xff] (!%p270_p10)  ;;  %vm442_vm0 = vcmask (!%p270_p10), 261120   ;;  %s2584_s18 = sand.u32 (!%p270_p10), 1, %s1860_s25  }
  0x12   : > { %1764 = vset.pattern.permute.xlu0 (!%p270_p10), %v1879_v1  ;;  %1765 = vset.pattern.permute.xlu1 (!%p270_p10), %v1879_v1  ;;  %v330_v20 = vld [vmem:[%s2758_s1] sm:$0xff] (!%p270_p10)  ;;  %v352_v21 = vld [vmem:[%s2759_s2 + $0x30] sm:$0xff] (!%p270_p10)  ;;  %v353_v22 = vld [vmem:[%s2759_s2 + $0x38] sm:$0xff] (!%p270_p10)  ;;  %s1532_s19 = sshll.u32 (!%p270_p10), %s2584_s18, 1  ;;  %s1381_s23 = scalar_lea.sflag (!%p270_p10), [#allocation5], %s2584_s18 }
  0x13   : > { %364 = vperm.xlu0 (!%p270_p10), %1764, %v346_v2   ;;  %374 = vperm.xlu1 (!%p270_p10), %1765, %v348_v3   ;;  %v331_v23 = vld [vmem:[%s2758_s1 + $0x8] sm:$0xff] (!%p270_p10)  ;;  %v354_v24 = vld [vmem:[%s2759_s2 + $0x40] sm:$0xff] (!%p270_p10)  ;;  %v332_v26 = vld [vmem:[%s2758_s1 + $0x10] sm:$0xff] (!%p270_p10)  ;;  %s2612_s20 = scalar_lea.vmem (!%p270_p10), [#allocation4], %s1532_s19  ;;  %s1882_s8 = smov (!%p270_p10), [#allocation4]  }
  0x14   : > { %v355_v25 = vld [vmem:[%s2759_s2 + $0x48] sm:$0xff] (!%p270_p10)  ;;  %v356_v27 = vld [vmem:[%s2759_s2 + $0x50] sm:$0xff] (!%p270_p10)  ;;  %v357_v28 = vld [vmem:[%s2759_s2 + $0x58] sm:$0xff] (!%p270_p10)  ;;  %s1415_s22 = sshll.u32 (!%p270_p10), %s2612_s20, 4  ;;  %s1770_s10 = sshll.u32 (!%p270_p10), %s1882_s8, 4  ;;  %s1416_s22 = int_to_ptr.vmem [resolvable:$true] %s1415_s22  ;;  %s1771_s10 = int_to_ptr.vmem [resolvable:$false] %s1770_s10 }
  0x15   : > { %v333_v29 = vld [vmem:[%s2758_s1 + $0x18] sm:$0xff] (!%p270_p10)  ;;  %v358_v30 = vld [vmem:[%s2759_s2 + $0x60] sm:$0xff] (!%p270_p10)  ;;  %v359_v31 = vld [vmem:[%s2759_s2 + $0x68] sm:$0xff] (!%p270_p10)  ;;  %s1766_s30 = scalar_lea.vmem (!%p270_p10), %s1416_s22, 32  ;;  %s1772_s12 = scalar_lea.vmem (!%p270_p10), %s1771_s10, 64 }
  0x16   : > { %v334_v32 = vld [vmem:[%s2758_s1 + $0x20] sm:$0xff] (!%p270_p10)  ;;  %v360_v33 = vld [vmem:[%s2759_s2 + $0x70] sm:$0xff] (!%p270_p10)  ;;  %v361_v34 = vld [vmem:[%s2759_s2 + $0x78] sm:$0xff] (!%p270_p10)  ;;  %p1767_p12 = scmp.ne.s32.totalorder (!%p270_p10), %s1416_s22, %s1766_s30  ;;  %p1773_p1 = scmp.lt.s32.totalorder (!%p270_p10), %s1416_s22, %s1771_s10 }
  0x17   : > { %369 = vperm.xlu0 (!%p270_p10), %1764, %v347_v4   ;;  %379 = vperm.xlu1 (!%p270_p10), %1765, %v349_v16   ;;  %v335_v35 = vld [vmem:[%s2758_s1 + $0x28] sm:$0xff] (!%p270_p10)  ;;  %v700_v36 = vld [vmem:[%s2761_s4] sm:$0xff] (!%p270_p10)  ;;  %v336_v38 = vld [vmem:[%s2758_s1 + $0x30] sm:$0xff] (!%p270_p10)  ;;  %p1774_p2 = scmp.lt.s32.totalorder (!%p270_p10), %s1772_s12, %s1766_s30 }
  0x18   : > { %s312_s15 = scalar_select %p311_p11, %s1868_s27, 1  ;;  %v701_v37 = vld [vmem:[%s2761_s4 + $0x8] sm:$0xff]  ;;  %v702_v39 = vld [vmem:[%s2761_s4 + $0x10] sm:$0xff]  ;;  %v703_v40 = vld [vmem:[%s2761_s4 + $0x18] sm:$0xff] }
  0x19   : > { %v337_v41 = vld [vmem:[%s2758_s1 + $0x38] sm:$0xff]  ;;  %v704_v42 = vld [vmem:[%s2761_s4 + $0x20] sm:$0xff]  ;;  %v705_v43 = vld [vmem:[%s2761_s4 + $0x28] sm:$0xff]  ;;  %p1768_p13 = pnand %p1767_p12, %p1966_p4  ;;  %p1775_p3 = por %p1774_p2, %p1773_p1 }
  0x1a   : > { %s1623_s16 = sshll.u32 %s312_s15, 6  ;;  %v338_v44 = vld [vmem:[%s2758_s1 + $0x40] sm:$0xff]  ;;  %v706_v45 = vld [vmem:[%s2761_s4 + $0x30] sm:$0xff]  ;;  %v707_v46 = vld [vmem:[%s2761_s4 + $0x38] sm:$0xff] }
  0x1b   : > { %s318_s21 = scalar_lea.vmem %s2757_s0, %s1623_s16  ;;  %384 = vperm.xlu0 %1764, %v350_v18   ;;  %389 = vperm.xlu1 %1765, %v351_v19   ;;  %v339_v47 = vld [vmem:[%s2758_s1 + $0x48] sm:$0xff]  ;;  %v708_v48 = vld [vmem:[%s2761_s4 + $0x40] sm:$0xff]  ;;  %v340_v50 = vld [vmem:[%s2758_s1 + $0x50] sm:$0xff]  ;;  %s1625_s16 = sshll.u32 %s1868_s27, 5 }
  0x1c   : > { %v323_v5 = vld [vmem:[%s318_s21 + $0x8] sm:$0xff]  ;;  %v325_v6 = vld [vmem:[%s318_s21 + $0x18] sm:$0xff]  ;;  %v322_v7 = vld [vmem:[%s318_s21] sm:$0xff]  ;;  %p1769_p0 = pneg %p1768_p13 }
  0x1d   : > { %v1626_v8 = vpack.c.bf16 %v325_v6, %v323_v5  ;;  %v324_v9 = vld [vmem:[%s318_s21 + $0x10] sm:$0xff]  ;;  %v327_v10 = vld [vmem:[%s318_s21 + $0x28] sm:$0xff]  ;;  %v329_v11 = vld [vmem:[%s318_s21 + $0x38] sm:$0xff] }
  0x1e   : > { %v1628_v12 = vpack.c.bf16 %v324_v9, %v322_v7  ;;  %v1630_v13 = vpack.c.bf16 %v329_v11, %v327_v10  ;;  %v326_v14 = vld [vmem:[%s318_s21 + $0x20] sm:$0xff]  ;;  %v328_v15 = vld [vmem:[%s318_s21 + $0x30] sm:$0xff]  ;;  %v709_v49 = vld [vmem:[%s2761_s4 + $0x48] sm:$0xff]  ;;  %s2681_s21 = scalar_lea.hbm %s2764_s7, %s1625_s16  ;;  %p1776_p5 = pnand %p1775_p3, %p1769_p0 }
  0x1f   : > { %1627 = vmatprep.subr.bf16.mxu0 %v1626_v8  ;;  %v1632_v17 = vpack.c.bf16 %v328_v15, %v326_v14  ;;  %394 = vperm.xlu0 %1764, %v352_v21   ;;  %v710_v51 = vld [vmem:[%s2761_s4 + $0x50] sm:$0xff]  ;;  %v711_v52 = vld [vmem:[%s2761_s4 + $0x58] sm:$0xff]  ;;  %v712_v54 = vld [vmem:[%s2761_s4 + $0x60] sm:$0xff] }
  0x20   : > { %1629 = vmatpush1.bf16.msra.mxu0 %v1628_v12  ;;  %399 = vperm.xlu1 %1765, %v353_v22   ;;  %v341_v53 = vld [vmem:[%s2758_s1 + $0x58] sm:$0xff]  ;;  %v713_v55 = vld [vmem:[%s2761_s4 + $0x68] sm:$0xff]  ;;  %v342_v56 = vld [vmem:[%s2758_s1 + $0x60] sm:$0xff] }
  0x21   : > { %1631 = vmatprep.subr.bf16.mxu0 %v1630_v13  ;;  %v714_v57 = vld [vmem:[%s2761_s4 + $0x70] sm:$0xff]  ;;  %v715_v58 = vld [vmem:[%s2761_s4 + $0x78] sm:$0xff]  ;;  %v343_v59 = vld [vmem:[%s2758_s1 + $0x68] sm:$0xff] }
  0x22   : > { %v344_v60 = vld [vmem:[%s2758_s1 + $0x70] sm:$0xff]  ;;  %v345_v61 = vld [vmem:[%s2758_s1 + $0x78] sm:$0xff] }
  0x23   : > { %404 = vperm.xlu0 %1764, %v354_v24  }
  0x24   : > { %1633 = vmatpush1.bf16.msra.mxu0 %v1632_v17  ;;  %409 = vperm.xlu1 %1765, %v355_v25  }
  0x27   : > { %1535 = vmatmul.mubr.msk.f32.vlgmr.msra.gmra.mrb[0].mxu0 %vm442_vm0, %v330_v20  ;;  %414 = vperm.xlu0 %1764, %v356_v27  }
  0x28   : > { %561 = vmatprep.mubr.f32.mxu0 %v1878_v0  ;;  %419 = vperm.xlu1 %1765, %v357_v28  }
  0x2b   : > { %1536 = vmatmul.mubr.msk.f32.gmra.mrb[2].mxu0 %vm442_vm0, %v331_v23  ;;  %424 = vperm.xlu0 %1764, %v358_v30  }
  0x2c   : > { %567 = vmatprep.mubr.f32.mxu0 %v1878_v0  ;;  %429 = vperm.xlu1 %1765, %v359_v31  }
  0x2f   : > { %1537 = vmatmul.mubr.msk.f32.gmra.mrb[4].mxu0 %vm442_vm0, %v332_v26  ;;  %434 = vperm.xlu0 %1764, %v360_v33  }
  0x30   : > { %573 = vmatprep.mubr.f32.mxu0 %v1878_v0  ;;  %439 = vperm.xlu1 %1765, %v361_v34  }
  0x33   : > { %1538 = vmatmul.mubr.msk.f32.gmra.mrb[6].mxu0 %vm442_vm0, %v333_v29  ;;  %718 = vperm.xlu0 %1764, %v700_v36  }
  0x34   : > { %579 = vmatprep.mubr.f32.mxu0 %v1878_v0  ;;  %723 = vperm.xlu1 %1765, %v701_v37  }
  0x37   : > { %1539 = vmatmul.mubr.msk.f32.gmra.mrb[8].mxu0 %vm442_vm0, %v334_v32  ;;  %728 = vperm.xlu0 %1764, %v702_v39  }
  0x38   : > { %585 = vmatprep.mubr.f32.mxu0 %v1878_v0  ;;  %733 = vperm.xlu1 %1765, %v703_v40  }
  0x3b   : > { %1540 = vmatmul.mubr.msk.f32.gmra.mrb[10].mxu0 %vm442_vm0, %v335_v35  ;;  %738 = vperm.xlu0 %1764, %v704_v42  }
  0x3c   : > { %591 = vmatprep.mubr.f32.mxu0 %v1878_v0  ;;  %743 = vperm.xlu1 %1765, %v705_v43  }
  0x3f   : > { %1541 = vmatmul.mubr.msk.f32.gmra.mrb[12].mxu0 %vm442_vm0, %v336_v38  ;;  %748 = vperm.xlu0 %1764, %v706_v45  }
  0x40   : > { %597 = vmatprep.mubr.f32.mxu0 %v1878_v0  ;;  %753 = vperm.xlu1 %1765, %v707_v46  }
  0x43   : > { %1542 = vmatmul.mubr.msk.f32.gmra.mrb[14].mxu0 %vm442_vm0, %v337_v41  ;;  %758 = vperm.xlu0 %1764, %v708_v48  }
  0x44   : > { %603 = vmatprep.mubr.f32.mxu0 %v1878_v0  ;;  %763 = vperm.xlu1 %1765, %v709_v49  }
  0x47   : > { %1543 = vmatmul.mubr.msk.f32.gmra.mrb[16].mxu0 %vm442_vm0, %v338_v44  ;;  %768 = vperm.xlu0 %1764, %v710_v51  }
  0x48   : > { %609 = vmatprep.mubr.f32.mxu0 %v1878_v0  ;;  %773 = vperm.xlu1 %1765, %v711_v52  }
  0x4b   : > { %1544 = vmatmul.mubr.msk.f32.gmra.mrb[18].mxu0 %vm442_vm0, %v339_v47  ;;  %778 = vperm.xlu0 %1764, %v712_v54  }
  0x4c   : > { %615 = vmatprep.mubr.f32.mxu0 %v1878_v0  ;;  %783 = vperm.xlu1 %1765, %v713_v55  }
  0x4f   : > { %1545 = vmatmul.mubr.msk.f32.gmra.mrb[20].mxu0 %vm442_vm0, %v340_v50  ;;  %788 = vperm.xlu0 %1764, %v714_v57  }
  0x50   : > { %621 = vmatprep.mubr.f32.mxu0 %v1878_v0  ;;  %793 = vperm.xlu1 %1765, %v715_v58  }
  0x53   : > { %1546 = vmatmul.mubr.msk.f32.gmra.mrb[22].mxu0 %vm442_vm0, %v341_v53 }
  0x54   : > { %627 = vmatprep.mubr.f32.mxu0 %v1878_v0 }
  0x57   : > { %1547 = vmatmul.mubr.msk.f32.gmra.mrb[24].mxu0 %vm442_vm0, %v342_v56 }
  0x58   : > { %633 = vmatprep.mubr.f32.mxu0 %v1878_v0 }
  0x5b   : > { %1548 = vmatmul.mubr.msk.f32.gmra.mrb[26].mxu0 %vm442_vm0, %v343_v59 }
  0x5c   : > { %639 = vmatprep.mubr.f32.mxu0 %v1878_v0 }
  0x5f   : > { %1549 = vmatmul.mubr.msk.f32.gmra.mrb[28].mxu0 %vm442_vm0, %v344_v60 }
  0x60   : > { %645 = vmatprep.mubr.f32.mxu0 %v1878_v0 }
  0x63   : > { %1550 = vmatmul.mubr.msk.f32.gmra.mrb[30].mxu0 %vm442_vm0, %v345_v61 }
  0x64   : > { %1322 = vmatprep.mubr.f32.mxu0 %v1878_v0 }
  0x92   : > { %v365_v62 = vpop.permute.xlu0 %364  ;;  %v375_v8 = vpop.permute.xlu1 %374 }
  0x96   : > { %v370_v3 = vpop.permute.xlu0 %369  ;;  %v380_v19 = vpop.permute.xlu1 %379 }
  0x9a   : > { %v385_v32 = vpop.permute.xlu0 %384  ;;  %v390_v35 = vpop.permute.xlu1 %389 }
  0x9e   : > { %v395_v48 = vpop.permute.xlu0 %394 }
  0x9f   : > { %v400_v51 = vpop.permute.xlu1 %399 }
  0xfa   : > { %v557_v63 = vpop.f32.mrb[0].mxu0 }
  0xfb   : > { %v559_v1 = vpop.f32.mrb[1].mxu0  ;;  %v558_v2 = vadd.f32 %v557_v63, %v365_v62 }
  0xfc   : > { %v560_v4 = vadd.f32 %v559_v1, %v365_v62  ;;  %v405_v1 = vpop.permute.xlu0 %404 }
  0xfd   : > { %v652_v10 = vmax.f32 %v558_v2, 0.0 }
  0xfe   : > { %v563_v5 = vpop.f32.mrb[2].mxu0  ;;  %v653_v12 = vmax.f32 %v560_v4, 0.0  ;;  %v410_v4 = vpop.permute.xlu1 %409 }
  0xff   : > { %v564_v6 = vadd.f32 %v563_v5, %v370_v3  ;;  %v565_v7 = vpop.f32.mrb[3].mxu0 }
 0x100   : > { %v566_v9 = vadd.f32 %v565_v7, %v370_v3 }
 0x101   : > { %v654_v11 = vmax.f32 %v564_v6, 0.0 }
 0x102   : > { %v655_v13 = vmax.f32 %v566_v9, 0.0  ;;  %v569_v14 = vpop.f32.mrb[4].mxu0 }
 0x103   : > { %v571_v15 = vpop.f32.mrb[5].mxu0  ;;  %v1636_v16 = vpack.c.bf16 %v654_v11, %v652_v10  ;;  %v570_v18 = vadd.f32 %v569_v14, %v375_v8 }
 0x104   : > { %v1634_v17 = vpack.c.bf16 %v655_v13, %v653_v12  ;;  %v572_v20 = vadd.f32 %v571_v15, %v375_v8 }
 0x105   : > { %v656_v25 = vmax.f32 %v570_v18, 0.0 }
 0x106   : > { %v575_v21 = vpop.f32.mrb[6].mxu0  ;;  %1635 = vmatprep.subr.bf16.mxu1 %v1634_v17  ;;  %v657_v27 = vmax.f32 %v572_v20, 0.0  ;;  %v415_v17 = vpop.permute.xlu0 %414 }
 0x107   : > { %v576_v22 = vadd.f32 %v575_v21, %v380_v19  ;;  %v577_v23 = vpop.f32.mrb[7].mxu0  ;;  %1637 = vmatpush1.bf16.msra.mxu1 %v1636_v16  ;;  %v420_v20 = vpop.permute.xlu1 %419 }
 0x108   : > { %v578_v24 = vadd.f32 %v577_v23, %v380_v19 }
 0x109   : > { %v658_v26 = vmax.f32 %v576_v22, 0.0 }
 0x10a   : > { %v659_v28 = vmax.f32 %v578_v24, 0.0  ;;  %v581_v29 = vpop.f32.mrb[8].mxu0 }
 0x10b   : > { %v1640_v30 = vpack.c.bf16 %v658_v26, %v656_v25  ;;  %v583_v31 = vpop.f32.mrb[9].mxu0  ;;  %v582_v34 = vadd.f32 %v581_v29, %v385_v32 }
 0x10c   : > { %v1638_v33 = vpack.c.bf16 %v659_v28, %v657_v27  ;;  %v584_v36 = vadd.f32 %v583_v31, %v385_v32 }
 0x10d   : > { %v660_v41 = vmax.f32 %v582_v34, 0.0 }
 0x10e   : > { %v587_v37 = vpop.f32.mrb[10].mxu0  ;;  %1639 = vmatprep.subr.bf16.mxu1 %v1638_v33  ;;  %v661_v43 = vmax.f32 %v584_v36, 0.0  ;;  %v425_v33 = vpop.permute.xlu0 %424 }
 0x10f   : > { %v588_v38 = vadd.f32 %v587_v37, %v390_v35  ;;  %v589_v39 = vpop.f32.mrb[11].mxu0  ;;  %1641 = vmatpush1.bf16.msra.mxu1 %v1640_v30  ;;  %v430_v36 = vpop.permute.xlu1 %429 }
 0x110   : > { %v590_v40 = vadd.f32 %v589_v39, %v390_v35 }
 0x111   : > { %v662_v42 = vmax.f32 %v588_v38, 0.0 }
 0x112   : > { %v663_v44 = vmax.f32 %v590_v40, 0.0  ;;  %v593_v45 = vpop.f32.mrb[12].mxu0 }
 0x113   : > { %v1644_v46 = vpack.c.bf16 %v662_v42, %v660_v41  ;;  %v595_v47 = vpop.f32.mrb[13].mxu0  ;;  %v594_v50 = vadd.f32 %v593_v45, %v395_v48 }
 0x114   : > { %v1642_v49 = vpack.c.bf16 %v663_v44, %v661_v43  ;;  %v596_v52 = vadd.f32 %v595_v47, %v395_v48 }
 0x115   : > { %v664_v57 = vmax.f32 %v594_v50, 0.0 }
 0x116   : > { %v599_v53 = vpop.f32.mrb[14].mxu0  ;;  %1643 = vmatprep.subr.bf16.mxu1 %v1642_v49  ;;  %v665_v59 = vmax.f32 %v596_v52, 0.0  ;;  %v435_v49 = vpop.permute.xlu0 %434 }
 0x117   : > { %v600_v54 = vadd.f32 %v599_v53, %v400_v51  ;;  %v601_v55 = vpop.f32.mrb[15].mxu0  ;;  %1645 = vmatpush1.bf16.msra.mxu1 %v1644_v46  ;;  %v440_v52 = vpop.permute.xlu1 %439 }
 0x118   : > { %v602_v56 = vadd.f32 %v601_v55, %v400_v51 }
 0x119   : > { %v666_v58 = vmax.f32 %v600_v54, 0.0 }
 0x11a   : > { %v667_v60 = vmax.f32 %v602_v56, 0.0  ;;  %v605_v61 = vpop.f32.mrb[16].mxu0 }
 0x11b   : > { %v1648_v62 = vpack.c.bf16 %v666_v58, %v664_v57  ;;  %v607_v63 = vpop.f32.mrb[17].mxu0  ;;  %v606_v3 = vadd.f32 %v605_v61, %v405_v1 }
 0x11c   : > { %v1646_v2 = vpack.c.bf16 %v667_v60, %v665_v59  ;;  %v608_v5 = vadd.f32 %v607_v63, %v405_v1  ;;  %v684_v1 = vld [vmem:[%s2760_s3] sm:$0xff] }
 0x11d   : > { %v668_v10 = vmax.f32 %v606_v3, 0.0  ;;  %v686_v3 = vld [vmem:[%s2760_s3 + $0x10] sm:$0xff] }
 0x11e   : > { %v611_v6 = vpop.f32.mrb[18].mxu0  ;;  %1647 = vmatprep.subr.bf16.mxu1 %v1646_v2  ;;  %v669_v12 = vmax.f32 %v608_v5, 0.0  ;;  %v685_v2 = vld [vmem:[%s2760_s3 + $0x8] sm:$0xff]  ;;  %v688_v5 = vld [vmem:[%s2760_s3 + $0x20] sm:$0xff] }
 0x11f   : > { %v612_v7 = vadd.f32 %v611_v6, %v410_v4  ;;  %v613_v8 = vpop.f32.mrb[19].mxu0  ;;  %1649 = vmatpush1.bf16.msra.mxu1 %v1648_v62  ;;  %v689_v6 = vld [vmem:[%s2760_s3 + $0x28] sm:$0xff] }
 0x120   : > { %v614_v9 = vadd.f32 %v613_v8, %v410_v4  ;;  %v687_v4 = vld [vmem:[%s2760_s3 + $0x18] sm:$0xff] }
 0x121   : > { %v670_v11 = vmax.f32 %v612_v7, 0.0  ;;  %v690_v7 = vld [vmem:[%s2760_s3 + $0x30] sm:$0xff]  ;;  %v691_v8 = vld [vmem:[%s2760_s3 + $0x38] sm:$0xff] }
 0x122   : > { %v671_v13 = vmax.f32 %v614_v9, 0.0  ;;  %v617_v14 = vpop.f32.mrb[20].mxu0  ;;  %v692_v9 = vld [vmem:[%s2760_s3 + $0x40] sm:$0xff] }
 0x123   : > { %v1652_v15 = vpack.c.bf16 %v670_v11, %v668_v10  ;;  %v619_v16 = vpop.f32.mrb[21].mxu0  ;;  %v618_v19 = vadd.f32 %v617_v14, %v415_v17  ;;  %v693_v10 = vld [vmem:[%s2760_s3 + $0x48] sm:$0xff]  ;;  %v694_v11 = vld [vmem:[%s2760_s3 + $0x50] sm:$0xff] }
 0x124   : > { %v1650_v18 = vpack.c.bf16 %v671_v13, %v669_v12  ;;  %v620_v21 = vadd.f32 %v619_v16, %v415_v17  ;;  %v695_v12 = vld [vmem:[%s2760_s3 + $0x58] sm:$0xff]  ;;  %v696_v13 = vld [vmem:[%s2760_s3 + $0x60] sm:$0xff]  ;;  %v697_v14 = vld [vmem:[%s2760_s3 + $0x68] sm:$0xff] }
 0x125   : > { %v672_v26 = vmax.f32 %v618_v19, 0.0  ;;  %v699_v16 = vld [vmem:[%s2760_s3 + $0x78] sm:$0xff]  ;;  %v719_v19 = vpop.permute.xlu0 %718 }
 0x126   : > { %v623_v22 = vpop.f32.mrb[22].mxu0  ;;  %1651 = vmatprep.subr.bf16.mxu1 %v1650_v18  ;;  %v673_v28 = vmax.f32 %v620_v21, 0.0 }
 0x127   : > { %v624_v23 = vadd.f32 %v623_v22, %v420_v20  ;;  %v625_v24 = vpop.f32.mrb[23].mxu0  ;;  %1653 = vmatpush1.bf16.msra.mxu1 %v1652_v15  ;;  %v698_v15 = vld [vmem:[%s2760_s3 + $0x70] sm:$0xff]  ;;  %v724_v22 = vpop.permute.xlu1 %723 }
 0x128   : > { %v626_v25 = vadd.f32 %v625_v24, %v420_v20 }
 0x129   : > { %v674_v27 = vmax.f32 %v624_v23, 0.0  ;;  %v729_v23 = vpop.permute.xlu0 %728 }
 0x12a   : > { %v675_v29 = vmax.f32 %v626_v25, 0.0  ;;  %v629_v30 = vpop.f32.mrb[24].mxu0 }
 0x12b   : > { %v1656_v31 = vpack.c.bf16 %v674_v27, %v672_v26  ;;  %v631_v32 = vpop.f32.mrb[25].mxu0  ;;  %v630_v35 = vadd.f32 %v629_v30, %v425_v33 }
 0x12c   : > { %v1654_v34 = vpack.c.bf16 %v675_v29, %v673_v28  ;;  %v632_v37 = vadd.f32 %v631_v32, %v425_v33 }
 0x12d   : > { %v676_v42 = vmax.f32 %v630_v35, 0.0 }
 0x12e   : > { %v635_v38 = vpop.f32.mrb[26].mxu0  ;;  %1655 = vmatprep.subr.bf16.mxu1 %v1654_v34  ;;  %v677_v44 = vmax.f32 %v632_v37, 0.0 }
 0x12f   : > { %v636_v39 = vadd.f32 %v635_v38, %v430_v36  ;;  %v637_v40 = vpop.f32.mrb[27].mxu0  ;;  %1657 = vmatpush1.bf16.msra.mxu1 %v1656_v31  ;;  %v734_v31 = vpop.permute.xlu1 %733 }
 0x130   : > { %v638_v41 = vadd.f32 %v637_v40, %v430_v36  ;;  %v739_v40 = vpop.permute.xlu0 %738 }
 0x131   : > { %v678_v43 = vmax.f32 %v636_v39, 0.0 }
 0x132   : > { %v679_v45 = vmax.f32 %v638_v41, 0.0  ;;  %v641_v46 = vpop.f32.mrb[28].mxu0 }
 0x133   : > { %v1660_v47 = vpack.c.bf16 %v678_v43, %v676_v42  ;;  %v643_v48 = vpop.f32.mrb[29].mxu0  ;;  %v642_v51 = vadd.f32 %v641_v46, %v435_v49 }
 0x134   : > { %v1658_v50 = vpack.c.bf16 %v679_v45, %v677_v44  ;;  %v644_v53 = vadd.f32 %v643_v48, %v435_v49 }
 0x135   : > { %v680_v58 = vmax.f32 %v642_v51, 0.0 }
 0x136   : > { %v647_v54 = vpop.f32.mrb[30].mxu0  ;;  %1659 = vmatprep.subr.bf16.mxu1 %v1658_v50  ;;  %v681_v60 = vmax.f32 %v644_v53, 0.0 }
 0x137   : > { %v648_v55 = vadd.f32 %v647_v54, %v440_v52  ;;  %v649_v56 = vpop.f32.mrb[31].mxu0  ;;  %1661 = vmatpush1.bf16.msra.mxu1 %v1660_v47  ;;  %v744_v47 = vpop.permute.xlu1 %743 }
 0x138   : > { %v650_v57 = vadd.f32 %v649_v56, %v440_v52  ;;  %v749_v54 = vpop.permute.xlu0 %748 }
 0x139   : > { %v682_v59 = vmax.f32 %v648_v55, 0.0 }
 0x13a   : > { %v683_v61 = vmax.f32 %v650_v57, 0.0 }
 0x13b   : > { %v1664_v62 = vpack.c.bf16 %v682_v59, %v680_v58 }
 0x13c   : > { %v1662_v63 = vpack.c.bf16 %v683_v61, %v681_v60  ;;  %v754_v61 = vpop.permute.xlu1 %753 }
 0x13e   : > { %1663 = vmatprep.subr.bf16.mxu1 %v1662_v63 }
 0x13f   : > { %1665 = vmatpush1.bf16.msra.mxu1 %v1664_v62 }
 0x142   : > { %861 = vmatmul.mubr.f32.vlgmr.msra.gmra.mrb[0].mxu1 %v684_v1 }
 0x143   : > { %866 = vmatprep.mubr.f32.mxu1 %v1878_v0 }
 0x146   : > { %867 = vmatmul.mubr.f32.gmra.mrb[2].mxu1 %v685_v2 }
 0x147   : > { %872 = vmatprep.mubr.f32.mxu1 %v1878_v0 }
 0x14a   : > { %873 = vmatmul.mubr.f32.gmra.mrb[4].mxu1 %v686_v3 }
 0x14b   : > { %878 = vmatprep.mubr.f32.mxu1 %v1878_v0 }
 0x14e   : > { %879 = vmatmul.mubr.f32.gmra.mrb[6].mxu1 %v687_v4 }
 0x14f   : > { %884 = vmatprep.mubr.f32.mxu1 %v1878_v0 }
 0x152   : > { %885 = vmatmul.mubr.f32.gmra.mrb[8].mxu1 %v688_v5  ;;  %v759_v5 = vpop.permute.xlu0 %758 }
 0x153   : > { %890 = vmatprep.mubr.f32.mxu1 %v1878_v0 }
 0x156   : > { %891 = vmatmul.mubr.f32.gmra.mrb[10].mxu1 %v689_v6 }
 0x157   : > { %896 = vmatprep.mubr.f32.mxu1 %v1878_v0 }
 0x15a   : > { %897 = vmatmul.mubr.f32.gmra.mrb[12].mxu1 %v690_v7 }
 0x15b   : > { %902 = vmatprep.mubr.f32.mxu1 %v1878_v0 }
 0x15e   : > { %903 = vmatmul.mubr.f32.gmra.mrb[14].mxu1 %v691_v8 }
 0x15f   : > { %908 = vmatprep.mubr.f32.mxu1 %v1878_v0 }
 0x162   : > { %909 = vmatmul.mubr.f32.gmra.mrb[16].mxu1 %v692_v9 }
 0x163   : > { %914 = vmatprep.mubr.f32.mxu1 %v1878_v0 }
 0x166   : > { %915 = vmatmul.mubr.f32.gmra.mrb[18].mxu1 %v693_v10 }
 0x167   : > { %920 = vmatprep.mubr.f32.mxu1 %v1878_v0 }
 0x16a   : > { %921 = vmatmul.mubr.f32.gmra.mrb[20].mxu1 %v694_v11 }
 0x16b   : > { %926 = vmatprep.mubr.f32.mxu1 %v1878_v0 }
 0x16e   : > { %927 = vmatmul.mubr.f32.gmra.mrb[22].mxu1 %v695_v12  ;;  %v764_v12 = vpop.permute.xlu1 %763 }
 0x16f   : > { %932 = vmatprep.mubr.f32.mxu1 %v1878_v0 }
 0x172   : > { %933 = vmatmul.mubr.f32.gmra.mrb[24].mxu1 %v696_v13 }
 0x173   : > { %938 = vmatprep.mubr.f32.mxu1 %v1878_v0 }
 0x176   : > { %939 = vmatmul.mubr.f32.gmra.mrb[26].mxu1 %v697_v14 }
 0x177   : > { %944 = vmatprep.mubr.f32.mxu1 %v1878_v0 }
 0x17a   : > { %945 = vmatmul.mubr.f32.gmra.mrb[28].mxu1 %v698_v15 }
 0x17b   : > { %950 = vmatprep.mubr.f32.mxu1 %v1878_v0 }
 0x17e   : > { %951 = vmatmul.mubr.f32.gmra.mrb[30].mxu1 %v699_v16 }
 0x215   : > { %v862_v17 = vpop.f32.mrb[0].mxu1 }
 0x216   : > { %v864_v18 = vpop.f32.mrb[1].mxu1  ;;  %v2227_v25 = vadd.f32 %v862_v17, %v719_v19 }
 0x217   : > { %v2231_v28 = vadd.f32 %v864_v18, %v719_v19  ;;  %v769_v19 = vpop.permute.xlu0 %768 }
 0x219   : > { %v868_v20 = vpop.f32.mrb[2].mxu1 }
 0x21a   : > { %v870_v21 = vpop.f32.mrb[3].mxu1  ;;  %v2239_v34 = vadd.f32 %v868_v20, %v724_v22 }
 0x21b   : > { %v2243_v37 = vadd.f32 %v870_v21, %v724_v22 }
 0x21d   : > { %v874_v24 = vpop.f32.mrb[4].mxu1 }
 0x21e   : > { %v2229_v26 = vadd.f32 %v874_v24, %v729_v23  ;;  %v876_v27 = vpop.f32.mrb[5].mxu1 }
 0x21f   : > { %v2233_v29 = vadd.f32 %v876_v27, %v729_v23 }
 0x220   : > { %v974_v30 = vmax.f32 %v2227_v25, %v2229_v26 }
 0x221   : > { %v995_v32 = vmax.f32 %v2231_v28, %v2233_v29  ;;  %v880_v33 = vpop.f32.mrb[6].mxu1 }
 0x222   : > { %v2241_v35 = vadd.f32 %v880_v33, %v734_v31  ;;  %v882_v36 = vpop.f32.mrb[7].mxu1 }
 0x223   : > { %v2245_v38 = vadd.f32 %v882_v36, %v734_v31 }
 0x224   : > { %v975_v39 = vmax.f32 %v2239_v34, %v2241_v35 }
 0x225   : > { %v996_v41 = vmax.f32 %v2243_v37, %v2245_v38  ;;  %v886_v42 = vpop.f32.mrb[8].mxu1 }
 0x226   : > { %v2251_v43 = vadd.f32 %v886_v42, %v739_v40  ;;  %v888_v44 = vpop.f32.mrb[9].mxu1 }
 0x227   : > { %v2253_v45 = vadd.f32 %v888_v44, %v739_v40 }
 0x228   : > { %v976_v46 = vmax.f32 %v974_v30, %v2251_v43  ;;  %v774_v30 = vpop.permute.xlu1 %773 }
 0x229   : > { %v997_v48 = vmax.f32 %v995_v32, %v2253_v45  ;;  %v892_v49 = vpop.f32.mrb[10].mxu1 }
 0x22a   : > { %v2257_v50 = vadd.f32 %v892_v49, %v744_v47  ;;  %v894_v51 = vpop.f32.mrb[11].mxu1 }
 0x22b   : > { %v2259_v52 = vadd.f32 %v894_v51, %v744_v47 }
 0x22c   : > { %v977_v53 = vmax.f32 %v975_v39, %v2257_v50  ;;  %v784_v51 = vpop.permute.xlu1 %783 }
 0x22d   : > { %v998_v55 = vmax.f32 %v996_v41, %v2259_v52  ;;  %v898_v56 = vpop.f32.mrb[12].mxu1  ;;  %v779_v41 = vpop.permute.xlu0 %778 }
 0x22e   : > { %v2263_v57 = vadd.f32 %v898_v56, %v749_v54  ;;  %v900_v58 = vpop.f32.mrb[13].mxu1 }
 0x22f   : > { %v2265_v59 = vadd.f32 %v900_v58, %v749_v54 }
 0x230   : > { %v978_v60 = vmax.f32 %v976_v46, %v2263_v57 }
 0x231   : > { %v999_v62 = vmax.f32 %v997_v48, %v2265_v59  ;;  %v904_v63 = vpop.f32.mrb[14].mxu1 }
 0x232   : > { %v2269_v1 = vadd.f32 %v904_v63, %v754_v61  ;;  %v906_v2 = vpop.f32.mrb[15].mxu1 }
 0x233   : > { %v2271_v3 = vadd.f32 %v906_v2, %v754_v61  ;;  %v789_v61 = vpop.permute.xlu0 %788 }
 0x234   : > { %v979_v4 = vmax.f32 %v977_v53, %v2269_v1 }
 0x235   : > { %v1000_v6 = vmax.f32 %v998_v55, %v2271_v3  ;;  %v910_v7 = vpop.f32.mrb[16].mxu1 }
 0x236   : > { %v2275_v8 = vadd.f32 %v910_v7, %v759_v5  ;;  %v912_v9 = vpop.f32.mrb[17].mxu1  ;;  %v794_v7 = vpop.permute.xlu1 %793 }
 0x237   : > { %v2277_v10 = vadd.f32 %v912_v9, %v759_v5 }
 0x238   : > { %v980_v11 = vmax.f32 %v978_v60, %v2275_v8 }
 0x239   : > { %v1001_v13 = vmax.f32 %v999_v62, %v2277_v10  ;;  %v916_v14 = vpop.f32.mrb[18].mxu1 }
 0x23a   : > { %v2281_v15 = vadd.f32 %v916_v14, %v764_v12  ;;  %v918_v16 = vpop.f32.mrb[19].mxu1 }
 0x23b   : > { %v2283_v17 = vadd.f32 %v918_v16, %v764_v12 }
 0x23c   : > { %v981_v18 = vmax.f32 %v979_v4, %v2281_v15 }
 0x23d   : > { %v1002_v20 = vmax.f32 %v1000_v6, %v2283_v17  ;;  %v922_v21 = vpop.f32.mrb[20].mxu1 }
 0x23e   : > { %v2287_v22 = vadd.f32 %v922_v21, %v769_v19  ;;  %v924_v23 = vpop.f32.mrb[21].mxu1  ;;  %v957_v21 = vlaneseq }
 0x23f   : > { %v2289_v24 = vadd.f32 %v924_v23, %v769_v19 }
 0x240   : > { %v982_v27 = vmax.f32 %v980_v11, %v2287_v22 }
 0x241   : > { %v1003_v31 = vmax.f32 %v1001_v13, %v2289_v24  ;;  %v928_v32 = vpop.f32.mrb[22].mxu1 }
 0x242   : > { %v2293_v33 = vadd.f32 %v928_v32, %v774_v30  ;;  %v930_v36 = vpop.f32.mrb[23].mxu1  ;;  %v2324_v32 = vshrl.u32 %v957_v21, 7 }
 0x243   : > { %v2295_v39 = vadd.f32 %v930_v36, %v774_v30 }
 0x244   : > { %v983_v40 = vmax.f32 %v981_v18, %v2293_v33 }
 0x245   : > { %v1004_v42 = vmax.f32 %v1002_v20, %v2295_v39  ;;  %v934_v44 = vpop.f32.mrb[24].mxu1 }
 0x246   : > { %v2299_v46 = vadd.f32 %v934_v44, %v779_v41  ;;  %v936_v47 = vpop.f32.mrb[25].mxu1  ;;  %v2327_v44 = vadd.s32 8, %v2324_v32 }
 0x247   : > { %v2301_v48 = vadd.f32 %v936_v47, %v779_v41  ;;  %v2330_v47 = vadd.s32 16, %v2324_v32 }
 0x248   : > { %v984_v49 = vmax.f32 %v982_v27, %v2299_v46 }
 0x249   : > { %v1005_v53 = vmax.f32 %v1003_v31, %v2301_v48  ;;  %v940_v54 = vpop.f32.mrb[26].mxu1 }
 0x24a   : > { %v2305_v55 = vadd.f32 %v940_v54, %v784_v51  ;;  %v942_v56 = vpop.f32.mrb[27].mxu1  ;;  %v2339_v54 = vadd.s32 40, %v2324_v32 }
 0x24b   : > { %v2307_v58 = vadd.f32 %v942_v56, %v784_v51  ;;  %v2333_v51 = vadd.s32 24, %v2324_v32  ;;  %v2342_v56 = vadd.s32 48, %v2324_v32 }
 0x24c   : > { %v985_v60 = vmax.f32 %v983_v40, %v2305_v55 }
 0x24d   : > { %v1006_v62 = vmax.f32 %v1004_v42, %v2307_v58  ;;  %v946_v63 = vpop.f32.mrb[28].mxu1 }
 0x24e   : > { %v2311_v2 = vadd.f32 %v946_v63, %v789_v61  ;;  %v948_v4 = vpop.f32.mrb[29].mxu1 }
 0x24f   : > { %v2313_v5 = vadd.f32 %v948_v4, %v789_v61  ;;  %v2348_v61 = vadd.s32 64, %v2324_v32  ;;  %v2356_v4 = vadd.s32 80, %v2324_v32 }
 0x250   : > { %v986_v6 = vmax.f32 %v984_v49, %v2311_v2 }
 0x251   : > { %v1007_v9 = vmax.f32 %v1005_v53, %v2313_v5  ;;  %v952_v11 = vpop.f32.mrb[30].mxu1  ;;  %v2336_v53 = vadd.s32 32, %v2324_v32 }
 0x252   : > { %v2317_v12 = vadd.f32 %v952_v11, %v794_v7  ;;  %v954_v13 = vpop.f32.mrb[31].mxu1  ;;  %v2397_v11 = vadd.s32 104, %v2324_v32 }
 0x253   : > { %v2319_v14 = vadd.f32 %v954_v13, %v794_v7  ;;  %v2362_v7 = vadd.s32 96, %v2324_v32  ;;  %v2400_v13 = vadd.s32 112, %v2324_v32 }
 0x254   : > { %v987_v16 = vmax.f32 %v985_v60, %v2317_v12  ;;  %v2345_v60 = vadd.s32 56, %v2324_v32 }
 0x255   : > { %v1008_v18 = vmax.f32 %v1006_v62, %v2319_v14  ;;  %v2351_v62 = vadd.s32 72, %v2324_v32 }
 0x256   : > { %v988_v19 = vmax.f32 %v986_v6, %v987_v16  ;;  %v2359_v6 = vadd.s32 88, %v2324_v32  ;;  %v2403_v16 = vadd.s32 120, %v2324_v32 }
 0x257   : > { %v1009_v20 = vmax.f32 %v1007_v9, %v1008_v18 }
 0x258   : > { %v989_v23 = vrot.slane %v988_v19, 4 }
 0x259   : > { %v1010_v27 = vrot.slane %v1009_v20, 4 }
 0x25a   : > { %v990_v30 = vmax.f32 %v988_v19, %v989_v23 }
 0x25b   : > { %v1011_v31 = vmax.f32 %v1009_v20, %v1010_v27 }
 0x25c   : > { %v991_v36 = vrot.slane %v990_v30, 2 }
 0x25d   : > { %v1012_v40 = vrot.slane %v1011_v31, 2 }
 0x25e   : > { %v992_v41 = vmax.f32 %v990_v30, %v991_v36 }
 0x25f   : > { %v1013_v42 = vmax.f32 %v1011_v31, %v1012_v40 }
 0x260   : > { %v993_v49 = vrot.slane %v992_v41, 1 }
 0x261   : > { %v1014_v9 = vrot.slane %v1013_v42, 1 }
 0x262   : > { %v2353_v63 = vmax.f32 %v992_v41, %v993_v49 }
 0x263   : > { %v2405_v18 = vmax.f32 %v1013_v42, %v1014_v9 }
 0x264   : > { %vm1016_vm1 = vcmp.eq.f32.partialorder %v2227_v25, %v2353_v63  ;;  %vm1018_vm2 = vcmp.eq.f32.partialorder %v2239_v34, %v2353_v63  ;;  %vm1020_vm3 = vcmp.eq.f32.partialorder %v2229_v26, %v2353_v63  ;;  %vm1022_vm4 = vcmp.eq.f32.partialorder %v2241_v35, %v2353_v63 }
 0x265   : > { %vm1024_vm5 = vcmp.eq.f32.partialorder %v2251_v43, %v2353_v63  ;;  %vm1026_vm6 = vcmp.eq.f32.partialorder %v2257_v50, %v2353_v63  ;;  %vm1028_vm7 = vcmp.eq.f32.partialorder %v2263_v57, %v2353_v63  ;;  %vm1030_vm8 = vcmp.eq.f32.partialorder %v2269_v1, %v2353_v63 }
 0x266   : > { %vm1032_vm9 = vcmp.eq.f32.partialorder %v2275_v8, %v2353_v63  ;;  %vm1034_vm10 = vcmp.eq.f32.partialorder %v2281_v15, %v2353_v63  ;;  %vm1036_vm11 = vcmp.eq.f32.partialorder %v2287_v22, %v2353_v63  ;;  %vm1038_vm12 = vcmp.eq.f32.partialorder %v2293_v33, %v2353_v63 }
 0x267   : > { %vm1040_vm13 = vcmp.eq.f32.partialorder %v2299_v46, %v2353_v63  ;;  %vm1042_vm14 = vcmp.eq.f32.partialorder %v2305_v55, %v2353_v63  ;;  %vm1044_vm15 = vcmp.eq.f32.partialorder %v2311_v2, %v2353_v63  ;;  %vm1046_vm0 = vcmp.eq.f32.partialorder %v2317_v12, %v2353_v63 }
 0x268   : > { %v1048_v19 = vsel %vm1016_vm1, %v2324_v32, 128  ;;  %v1050_v20 = vsel %vm1018_vm2, %v2327_v44, 128  ;;  %v1052_v23 = vsel %vm1020_vm3, %v2330_v47, 128  ;;  %v1054_v27 = vsel %vm1022_vm4, %v2333_v51, 128 }
 0x269   : > { %v1056_v25 = vsel %vm1024_vm5, %v2336_v53, 128  ;;  %v1058_v34 = vsel %vm1026_vm6, %v2339_v54, 128  ;;  %v1060_v26 = vsel %vm1028_vm7, %v2342_v56, 128  ;;  %v1062_v35 = vsel %vm1030_vm8, %v2345_v60, 128 }
 0x26a   : > { %v1064_v43 = vsel %vm1032_vm9, %v2348_v61, 128  ;;  %v1066_v50 = vsel %vm1034_vm10, %v2351_v62, 128  ;;  %v1068_v57 = vsel %vm1036_vm11, %v2356_v4, 128  ;;  %v1070_v1 = vsel %vm1038_vm12, %v2359_v6, 128 }
 0x26b   : > { %vm1080_vm1 = vcmp.lt.s32.totalorder %v1048_v19, %v1052_v23  ;;  %vm1082_vm2 = vcmp.lt.s32.totalorder %v1050_v20, %v1054_v27  ;;  %vm1017_vm3 = vcmp.eq.f32.partialorder %v2231_v28, %v2405_v18  ;;  %vm1019_vm4 = vcmp.eq.f32.partialorder %v2243_v37, %v2405_v18 }
 0x26c   : > { %v1081_v8 = vsel %vm1080_vm1, %v1048_v19, %v1052_v23  ;;  %v1083_v15 = vsel %vm1082_vm2, %v1050_v20, %v1054_v27  ;;  %vm1033_vm6 = vcmp.eq.f32.partialorder %v2277_v10, %v2405_v18  ;;  %vm1041_vm12 = vcmp.eq.f32.partialorder %v2301_v48, %v2405_v18 }
 0x26d   : > { %vm1084_vm7 = vcmp.lt.s32.totalorder %v1081_v8, %v1056_v25  ;;  %vm1086_vm8 = vcmp.lt.s32.totalorder %v1083_v15, %v1058_v34  ;;  %vm1043_vm9 = vcmp.eq.f32.partialorder %v2307_v58, %v2405_v18  ;;  %v1072_v41 = vsel %vm1040_vm13, %v2362_v7, 128 }
 0x26e   : > { %v1085_v22 = vsel %vm1084_vm7, %v1081_v8, %v1056_v25  ;;  %v1087_v33 = vsel %vm1086_vm8, %v1083_v15, %v1058_v34  ;;  %vm1039_vm8 = vcmp.eq.f32.partialorder %v2295_v39, %v2405_v18  ;;  %v1074_v42 = vsel %vm1042_vm14, %v2397_v11, 128 }
 0x26f   : > { %vm1088_vm1 = vcmp.lt.s32.totalorder %v1085_v22, %v1060_v26  ;;  %vm1090_vm2 = vcmp.lt.s32.totalorder %v1087_v33, %v1062_v35  ;;  %v1076_v19 = vsel %vm1044_vm15, %v2400_v13, 128  ;;  %v1078_v20 = vsel %vm1046_vm0, %v2403_v16, 128 }
 0x270   : > { %v1089_v30 = vsel %vm1088_vm1, %v1085_v22, %v1060_v26  ;;  %v1091_v31 = vsel %vm1090_vm2, %v1087_v33, %v1062_v35  ;;  %vm1045_vm1 = vcmp.eq.f32.partialorder %v2313_v5, %v2405_v18  ;;  %vm1047_vm2 = vcmp.eq.f32.partialorder %v2319_v14, %v2405_v18 }
 0x271   : > { %vm1092_vm11 = vcmp.lt.s32.totalorder %v1089_v30, %v1064_v43  ;;  %vm1094_vm10 = vcmp.lt.s32.totalorder %v1091_v31, %v1066_v50  ;;  %v1049_v55 = vsel %vm1017_vm3, %v2324_v32, 128  ;;  %v1051_v2 = vsel %vm1019_vm4, %v2327_v44, 128 }
 0x272   : > { %v1093_v36 = vsel %vm1092_vm11, %v1089_v30, %v1064_v43  ;;  %v1095_v40 = vsel %vm1094_vm10, %v1091_v31, %v1066_v50  ;;  %vm2767_vm15 = vcmp.eq.f32.partialorder %v2233_v29, %v2405_v18  ;;  %vm2768_vm0 = vcmp.eq.f32.partialorder %v2245_v38, %v2405_v18 }
 0x273   : > { %vm1096_vm7 = vcmp.lt.s32.totalorder %v1093_v36, %v1068_v57  ;;  %vm1098_vm5 = vcmp.lt.s32.totalorder %v1095_v40, %v1070_v1  ;;  %v1053_v12 = vsel %vm2767_vm15, %v2330_v47, 128  ;;  %v1055_v63 = vsel %vm2768_vm0, %v2333_v51, 128 }
 0x274   : > { %v1097_v49 = vsel %vm1096_vm7, %v1093_v36, %v1068_v57  ;;  %v1099_v9 = vsel %vm1098_vm5, %v1095_v40, %v1070_v1  ;;  %vm2769_vm4 = vcmp.eq.f32.partialorder %v2253_v45, %v2405_v18  ;;  %vm1119_vm5 = vcmp.lt.s32.totalorder %v1049_v55, %v1053_v12 }
 0x275   : > { %vm1100_vm10 = vcmp.lt.s32.totalorder %v1097_v49, %v1072_v41  ;;  %vm1102_vm11 = vcmp.lt.s32.totalorder %v1099_v9, %v1074_v42  ;;  %v1057_v37 = vsel %vm2769_vm4, %v2336_v53, 128  ;;  %vm1121_vm7 = vcmp.lt.s32.totalorder %v1051_v2, %v1055_v63 }
 0x276   : > { %v1101_v46 = vsel %vm1100_vm10, %v1097_v49, %v1072_v41  ;;  %v1103_v23 = vsel %vm1102_vm11, %v1099_v9, %v1074_v42  ;;  %vm2770_vm10 = vcmp.eq.f32.partialorder %v2259_v52, %v2405_v18  ;;  %v1120_v26 = vsel %vm1119_vm5, %v1049_v55, %v1053_v12 }
 0x277   : > { %vm1104_vm13 = vcmp.lt.s32.totalorder %v1101_v46, %v1076_v19  ;;  %vm1106_vm14 = vcmp.lt.s32.totalorder %v1103_v23, %v1078_v20  ;;  %v1059_v29 = vsel %vm2770_vm10, %v2339_v54, 128  ;;  %v1122_v38 = vsel %vm1121_vm7, %v1051_v2, %v1055_v63 }
 0x278   : > { %v1105_v27 = vsel %vm1104_vm13, %v1101_v46, %v1076_v19  ;;  %v1107_v28 = vsel %vm1106_vm14, %v1103_v23, %v1078_v20  ;;  %vm2771_vm11 = vcmp.eq.f32.partialorder %v2265_v59, %v2405_v18  ;;  %vm1123_vm13 = vcmp.lt.s32.totalorder %v1120_v26, %v1057_v37 }
 0x279   : > { %vm1108_vm3 = vcmp.lt.s32.totalorder %v1105_v27, %v1107_v28  ;;  %v1061_v35 = vsel %vm2771_vm11, %v2342_v56, 128  ;;  %vm1125_vm14 = vcmp.lt.s32.totalorder %v1122_v38, %v1059_v29  ;;  %vm2772_vm0 = vcmp.eq.f32.partialorder %v2271_v3, %v2405_v18 }
 0x27a   : > { %v1109_v25 = vsel %vm1108_vm3, %v1105_v27, %v1107_v28  ;;  %v1063_v45 = vsel %vm2772_vm0, %v2345_v60, 128  ;;  %v1124_v43 = vsel %vm1123_vm13, %v1120_v26, %v1057_v37  ;;  %v1126_v50 = vsel %vm1125_vm14, %v1122_v38, %v1059_v29 }
 0x27b   : > { %v1110_v34 = vrot.slane %v1109_v25, 4  ;;  %vm1127_vm3 = vcmp.lt.s32.totalorder %v1124_v43, %v1061_v35  ;;  %vm1129_vm4 = vcmp.lt.s32.totalorder %v1126_v50, %v1063_v45  ;;  %v1065_v52 = vsel %vm1033_vm6, %v2348_v61, 128 }
 0x27c   : > { %vm2773_vm5 = vcmp.eq.f32.partialorder %v2283_v17, %v2405_v18  ;;  %v1128_v1 = vsel %vm1127_vm3, %v1124_v43, %v1061_v35  ;;  %v1130_v8 = vsel %vm1129_vm4, %v1126_v50, %v1063_v45  ;;  %vm2774_vm7 = vcmp.eq.f32.partialorder %v2289_v24, %v2405_v18 }
 0x27d   : > { %vm1111_vm15 = vcmp.lt.s32.totalorder %v1109_v25, %v1110_v34  ;;  %v1067_v59 = vsel %vm2773_vm5, %v2351_v62, 128  ;;  %v1069_v3 = vsel %vm2774_vm7, %v2356_v4, 128  ;;  %vm1131_vm10 = vcmp.lt.s32.totalorder %v1128_v1, %v1065_v52 }
 0x27e   : > { %v1112_v57 = vsel %vm1111_vm15, %v1109_v25, %v1110_v34  ;;  %vm1133_vm11 = vcmp.lt.s32.totalorder %v1130_v8, %v1067_v59  ;;  %v1071_v10 = vsel %vm1039_vm8, %v2359_v6, 128  ;;  %v1132_v22 = vsel %vm1131_vm10, %v1128_v1, %v1065_v52 }
 0x27f   : > { %v1113_v15 = vrot.slane %v1112_v57, 2  ;;  %v1134_v33 = vsel %vm1133_vm11, %v1130_v8, %v1067_v59  ;;  %vm1135_vm6 = vcmp.lt.s32.totalorder %v1132_v22, %v1069_v3  ;;  %v1073_v17 = vsel %vm1041_vm12, %v2362_v7, 128 }
 0x280   : > { %vm1137_vm13 = vcmp.lt.s32.totalorder %v1134_v33, %v1071_v10  ;;  %v1075_v24 = vsel %vm1043_vm9, %v2397_v11, 128  ;;  %v1136_v30 = vsel %vm1135_vm6, %v1132_v22, %v1069_v3  ;;  %v1077_v39 = vsel %vm1045_vm1, %v2400_v13, 128 }
 0x281   : > { %v1138_v31 = vsel %vm1137_vm13, %v1134_v33, %v1071_v10  ;;  %vm1139_vm8 = vcmp.lt.s32.totalorder %v1136_v30, %v1073_v17  ;;  %vm1114_vm15 = vcmp.lt.s32.totalorder %v1112_v57, %v1113_v15  ;;  %v1079_v48 = vsel %vm1047_vm2, %v2403_v16, 128 }
 0x282   : > { %vm1141_vm14 = vcmp.lt.s32.totalorder %v1138_v31, %v1075_v24  ;;  %v1140_v36 = vsel %vm1139_vm8, %v1136_v30, %v1073_v17  ;;  %v1115_v42 = vsel %vm1114_vm15, %v1112_v57, %v1113_v15  ;;  %v1880_v46 = vmov 1966171168  }
 0x283   : > { %v1142_v40 = vsel %vm1141_vm14, %v1138_v31, %v1075_v24  ;;  %vm1143_vm12 = vcmp.lt.s32.totalorder %v1140_v36, %v1077_v39  ;;  %v1116_v5 = vrot.slane %v1115_v42, 1  ;;  %v1357_v14 = vunpack.c.l.s4 %v1880_v46 }
 0x284   : > { %vm1145_vm0 = vcmp.lt.s32.totalorder %v1142_v40, %v1079_v48  ;;  %v1144_v58 = vsel %vm1143_vm12, %v1140_v36, %v1077_v39  ;;  %v1881_v63 = vmov 1.0|1.0  }
 0x285   : > { %v1146_v41 = vsel %vm1145_vm0, %v1142_v40, %v1079_v48  ;;  %vm1117_vm3 = vcmp.lt.s32.totalorder %v1115_v42, %v1116_v5  ;;  %v1358_v2 = vunpack.c.0.s8 %v1357_v14 }
 0x286   : > { %vm1147_vm9 = vcmp.lt.s32.totalorder %v1144_v58, %v1146_v41  ;;  %v2567_v23 = vsel %vm1117_vm3, %v1115_v42, %v1116_v5 }
 0x287   : > { %v1148_v49 = vsel %vm1147_vm9, %v1144_v58, %v1146_v41  ;;  %vm1158_vm5 = vcmp.eq.s32.totalorder %v2324_v32, %v2567_v23  ;;  %vm1160_vm7 = vcmp.eq.s32.totalorder %v2327_v44, %v2567_v23  ;;  %v1361_v27 = vsub.s32 %v1358_v2, %v2324_v32 }
 0x288   : > { %v1149_v9 = vrot.slane %v1148_v49, 4  ;;  %vm1668_vm14 = vmpackc.low %vm1160_vm7, %vm1158_vm5  ;;  %vm1162_vm12 = vcmp.eq.s32.totalorder %v2330_v47, %v2567_v23  ;;  %vm1164_vm0 = vcmp.eq.s32.totalorder %v2333_v51, %v2567_v23  ;;  %vm1168_vm5 = vcmp.eq.s32.totalorder %v2339_v54, %v2567_v23 }
 0x289   : > { %vm1672_vm3 = vmpackc.low %vm1164_vm0, %vm1162_vm12  ;;  %vm1372_vm7 = vcmp.lt.s32.totalorder %v957_v21, 256  ;;  %v1254_v21 = vld [vmem:[%s2762_s5] sm:$0xff] }
 0x28a   : > { %vm1150_vm1 = vcmp.lt.s32.totalorder %v1148_v49, %v1149_v9 }
 0x28b   : > { %v1151_v19 = vsel %vm1150_vm1, %v1148_v49, %v1149_v9 }
 0x28c   : > { %v1152_v20 = vrot.slane %v1151_v19, 2 }
 0x28e   : > { %vm1153_vm4 = vcmp.lt.s32.totalorder %v1151_v19, %v1152_v20 }
 0x28f   : > { %v1154_v18 = vsel %vm1153_vm4, %v1151_v19, %v1152_v20 }
 0x290   : > { %v1155_v55 = vrot.slane %v1154_v18, 1 }
 0x292   : > { %vm1156_vm2 = vcmp.lt.s32.totalorder %v1154_v18, %v1155_v55 }
 0x293   : > { %v2569_v12 = vsel %vm1156_vm2, %v1154_v18, %v1155_v55  ;;  %vm1166_vm2 = vcmp.eq.s32.totalorder %v2336_v53, %v2567_v23 }
 0x294   : > { %vm1159_vm10 = vcmp.eq.s32.totalorder %v2324_v32, %v2569_v12  ;;  %vm1161_vm11 = vcmp.eq.s32.totalorder %v2327_v44, %v2569_v12  ;;  %vm1163_vm6 = vcmp.eq.s32.totalorder %v2330_v47, %v2569_v12  ;;  %vm1165_vm13 = vcmp.eq.s32.totalorder %v2333_v51, %v2569_v12  ;;  %v1255_v51 = vld [vmem:[%s2762_s5 + $0x8] sm:$0xff] }
 0x295   : > { %vm1666_vm8 = vmpackc.low %vm1161_vm11, %vm1159_vm10  ;;  %vm1167_vm9 = vcmp.eq.s32.totalorder %v2336_v53, %v2569_v12  ;;  %vm1169_vm1 = vcmp.eq.s32.totalorder %v2339_v54, %v2569_v12  ;;  %v1355_v32 = vcombine.low %v2567_v23, %v2569_v12  ;;  %vm1171_vm10 = vcmp.eq.s32.totalorder %v2342_v56, %v2569_v12  ;;  %v1256_v53 = vld [vmem:[%s2762_s5 + $0x10] sm:$0xff]  ;;  %v1257_v54 = vld [vmem:[%s2762_s5 + $0x18] sm:$0xff] }
 0x296   : > { %1667 = vmatprep.subr.msk.bf16.mxu0 %vm1666_vm8, %v1881_v63  ;;  %vm1670_vm15 = vmpackc.low %vm1165_vm13, %vm1163_vm6  ;;  %vm1173_vm11 = vcmp.eq.s32.totalorder %v2345_v60, %v2569_v12  ;;  %vm1170_vm8 = vcmp.eq.s32.totalorder %v2342_v56, %v2567_v23  ;;  %vm1177_vm12 = vcmp.eq.s32.totalorder %v2351_v62, %v2569_v12 }
 0x297   : > { %1669 = vmatpush1.bf16.msk.msra.mxu0 %vm1668_vm14, %v1881_v63  ;;  %v1362_v44 = vrot.slane %v1355_v32, %v1361_v27  ;;  %vm1674_vm4 = vmpackc.low %vm1169_vm1, %vm1167_vm9  ;;  %vm1172_vm14 = vcmp.eq.s32.totalorder %v2345_v60, %v2567_v23  ;;  %vm1174_vm1 = vcmp.eq.s32.totalorder %v2348_v61, %v2567_v23 }
 0x298   : > { %1671 = vmatprep.subr.msk.bf16.mxu0 %vm1670_vm15, %v1881_v63  ;;  %vm1676_vm6 = vmpackc.low %vm1168_vm5, %vm1166_vm2  ;;  %vm1175_vm15 = vcmp.eq.s32.totalorder %v2348_v61, %v2569_v12  ;;  %vm1181_vm2 = vcmp.eq.s32.totalorder %v2359_v6, %v2569_v12 }
 0x299   : > { %v1369_v47 = vrot.slane %v1362_v44, %v1361_v27  ;;  %vm1678_vm13 = vmpackc.low %vm1173_vm11, %vm1171_vm10  ;;  %vm1178_vm10 = vcmp.eq.s32.totalorder %v2356_v4, %v2567_v23  ;;  %vm1180_vm11 = vcmp.eq.s32.totalorder %v2359_v6, %v2567_v23 }
 0x29a   : > { %vm1680_vm0 = vmpackc.low %vm1172_vm14, %vm1170_vm8 }
 0x29b   : > { %1673 = vmatpush1.bf16.msk.msra.mxu0 %vm1672_vm3, %v1881_v63  ;;  %1374 = vst.msk [vmem:[%s2612_s20] sm:$0x3] %vm1372_vm7, %v1369_v47  ;;  %vm1682_vm9 = vmpackc.low %vm1177_vm12, %vm1175_vm15  ;;  %vm1176_vm3 = vcmp.eq.s32.totalorder %v2351_v62, %v2567_v23  ;;  %vm1182_vm15 = vcmp.eq.s32.totalorder %v2362_v7, %v2567_v23  ;;  %vm1184_vm12 = vcmp.eq.s32.totalorder %v2397_v11, %v2567_v23 }
 0x29c   : > { %1675 = vmatprep.subr.msk.bf16.mxu0 %vm1674_vm4, %v1881_v63  ;;  %vm1179_vm4 = vcmp.eq.s32.totalorder %v2356_v4, %v2569_v12  ;;  %vm1684_vm5 = vmpackc.low %vm1176_vm3, %vm1174_vm1 }
 0x29d   : > { %vm1686_vm7 = vmpackc.low %vm1181_vm2, %vm1179_vm4  ;;  %vm1186_vm4 = vcmp.eq.s32.totalorder %v2400_v13, %v2567_v23  ;;  %vm1188_vm2 = vcmp.eq.s32.totalorder %v2403_v16, %v2567_v23 }
 0x29e   : > { %vm1688_vm8 = vmpackc.low %vm1180_vm11, %vm1178_vm10 }
 0x29f   : > { %1677 = vmatpush1.bf16.msk.msra.mxu0 %vm1676_vm6, %v1881_v63  ;;  %vm1183_vm6 = vcmp.eq.s32.totalorder %v2362_v7, %v2569_v12  ;;  %vm1692_vm1 = vmpackc.low %vm1184_vm12, %vm1182_vm15 }
 0x2a0   : > { %1679 = vmatprep.subr.msk.bf16.mxu0 %vm1678_vm13, %v1881_v63  ;;  %vm1185_vm13 = vcmp.eq.s32.totalorder %v2397_v11, %v2569_v12 }
 0x2a1   : > { %vm1690_vm14 = vmpackc.low %vm1185_vm13, %vm1183_vm6 }
 0x2a3   : > { %1681 = vmatpush1.bf16.msk.msra.mxu0 %vm1680_vm0, %v1881_v63  ;;  %vm1187_vm0 = vcmp.eq.s32.totalorder %v2400_v13, %v2569_v12 }
 0x2a4   : > { %1683 = vmatprep.subr.msk.bf16.mxu0 %vm1682_vm9, %v1881_v63  ;;  %vm1189_vm9 = vcmp.eq.s32.totalorder %v2403_v16, %v2569_v12 }
 0x2a5   : > { %vm1694_vm3 = vmpackc.low %vm1189_vm9, %vm1187_vm0 }
 0x2a7   : > { %1685 = vmatpush1.bf16.msk.msra.mxu0 %vm1684_vm5, %v1881_v63  ;;  %vm1696_vm5 = vmpackc.low %vm1188_vm2, %vm1186_vm4 }
 0x2a8   : > { %1687 = vmatprep.subr.msk.bf16.mxu0 %vm1686_vm7, %v1881_v63 }
 0x2ab   : > { %1689 = vmatpush1.bf16.msk.msra.mxu0 %vm1688_vm8, %v1881_v63 }
 0x2ac   : > { %1691 = vmatprep.subr.msk.bf16.mxu0 %vm1690_vm14, %v1881_v63 }
 0x2af   : > { %1693 = vmatpush1.bf16.msk.msra.mxu0 %vm1692_vm1, %v1881_v63 }
 0x2b0   : > { %1695 = vmatprep.subr.msk.bf16.mxu0 %vm1694_vm3, %v1881_v63 }
 0x2b3   : > { %1697 = vmatpush1.bf16.msk.msra.mxu0 %vm1696_vm5, %v1881_v63 }
 0x2b6   : > { %1323 = vmatmul.mubr.f32.vlgmr.msra.gmra.mrb[32].mxu0 %v1254_v21 }
 0x2b7   : > { %1328 = vmatprep.mubr.f32.mxu0 %v1878_v0 }
 0x2ba   : > { %1329 = vmatmul.mubr.f32.gmra.mrb[34].mxu0 %v1255_v51 }
 0x2bb   : > { %1334 = vmatprep.mubr.f32.mxu0 %v1878_v0 }
 0x2be   : > { %1335 = vmatmul.mubr.f32.gmra.mrb[36].mxu0 %v1256_v53 }
 0x2bf   : > { %1340 = vmatprep.mubr.f32.mxu0 %v1878_v0 }
 0x2c2   : > { %1341 = vmatmul.mubr.f32.gmra.mrb[38].mxu0 %v1257_v54 }
 0x2c3   : > { %1779 = shalt.err (!%p1776_p5)
}
 0x2c4   : > { %s1780_s20 = scalar_lea.hbm %s2681_s21, 32  ;;  %s1784_s17 = scalar_lea.hbm %s2764_s7, 64 }
 0x2c5   : > { %p1781_p6 = scmp.ne.s32.totalorder %s2681_s21, %s1780_s20  ;;  %p1785_p10 = scmp.lt.u32.totalorder %s2681_s21, %s2764_s7 }
 0x2c6   : > { %p1786_p11 = scmp.lt.u32.totalorder %s1784_s17, %s1780_s20  ;;  %p1788_p13 = scmp.lt.u32.totalorder %s1780_s20, %s2681_s21 }
 0x2c7   : > { %p1782_p7 = pnand %p1781_p6, %p1966_p4 }
 0x2c8   : > { %p1787_p12 = por %p1786_p11, %p1785_p10 }
 0x2c9   : > { %p1783_p9 = pneg %p1782_p7 }
 0x2ca   : > { %p1789_p0 = por %p1788_p13, %p1787_p12 }
 0x2cc   : > { %p1790_p1 = pnand %p1789_p0, %p1783_p9 }
 0x2ce   : > { %1793 = shalt.err (!%p1790_p1)
}
 0x2cf   : > { %1699 = dma.vmem_to_hbm [thread:$0]  (%p1966_p4), %s1416_s22, 32, %s2681_s21, %s1381_s23  }
 0x2d0   : > { %s1531_s30 = sshll.u32 %s2584_s18, 6  ;;  %s1624_s20 = sshll.u32 %s1868_s27, 10 }
 0x2d1   : > { %s302_s10 = scalar_lea.vmem [#allocation2], %s1531_s30  ;;  %s2709_s23 = scalar_lea.hbm %s2763_s6, %s1624_s20 }
 0x2d2   : > { %s1396_s12 = sshll.u32 %s302_s10, 4  ;;  %s1376_s15 = scalar_lea.sflag [#allocation3], %s2584_s18  ;;  %s2704_s12 = int_to_ptr.vmem [resolvable:$true] %s1396_s12 }
 0x2d3   : > { %s1794_s16 = scalar_lea.vmem %s2704_s12, 1024  ;;  %s1883_s27 = smov [#allocation2]  }
 0x2d4   : > { %p1795_p2 = scmp.ne.s32.totalorder %s2704_s12, %s1794_s16  ;;  %s1798_s17 = sshll.u32 %s1883_s27, 4  ;;  %s1799_s17 = int_to_ptr.vmem [resolvable:$false] %s1798_s17 }
 0x2d5   : > { %s1800_s19 = scalar_lea.vmem %s1799_s17, 2048  ;;  %p1801_p6 = scmp.lt.s32.totalorder %s2704_s12, %s1799_s17 }
 0x2d6   : > { %p1796_p3 = pnand %p1795_p2, %p1966_p4  ;;  %p1802_p7 = scmp.lt.s32.totalorder %s1800_s19, %s1794_s16 }
 0x2d8   : > { %p1797_p5 = pneg %p1796_p3  ;;  %p1803_p9 = por %p1802_p7, %p1801_p6 }
 0x2da   : > { %p1804_p10 = pnand %p1803_p9, %p1797_p5 }
 0x389   : > { %v1324_v0 = vpop.f32.mrb[32].mxu0 }
 0x38a   : > { %1347 = vst [vmem:[%s302_s10] sm:$0xff] %v1324_v0  ;;  %v1326_v56 = vpop.f32.mrb[33].mxu0 }
 0x38b   : > { %1348 = vst [vmem:[%s302_s10 + $0x8] sm:$0xff] %v1326_v56 }
 0x38d   : > { %v1330_v60 = vpop.f32.mrb[34].mxu0 }
 0x38e   : > { %1349 = vst [vmem:[%s302_s10 + $0x10] sm:$0xff] %v1330_v60  ;;  %v1332_v61 = vpop.f32.mrb[35].mxu0 }
 0x38f   : > { %1350 = vst [vmem:[%s302_s10 + $0x18] sm:$0xff] %v1332_v61 }
 0x391   : > { %v1336_v62 = vpop.f32.mrb[36].mxu0 }
 0x392   : > { %1351 = vst [vmem:[%s302_s10 + $0x20] sm:$0xff] %v1336_v62  ;;  %v1338_v4 = vpop.f32.mrb[37].mxu0 }
 0x393   : > { %1352 = vst [vmem:[%s302_s10 + $0x28] sm:$0xff] %v1338_v4 }
 0x395   : > { %v1342_v6 = vpop.f32.mrb[38].mxu0 }
 0x396   : > { %1353 = vst [vmem:[%s302_s10 + $0x30] sm:$0xff] %v1342_v6  ;;  %v1344_v7 = vpop.f32.mrb[39].mxu0 }
 0x397   : > { %1354 = vst [vmem:[%s302_s10 + $0x38] sm:$0xff] %v1344_v7 }
 0x398   : > { %1807 = shalt.err (!%p1804_p10)
}
 0x399   : > { %s1808_s8 = scalar_lea.hbm %s2709_s23, 1024  ;;  %s1812_s20 = scalar_lea.hbm %s2763_s6, 2048 }
 0x39a   : > { %p1809_p11 = scmp.ne.s32.totalorder %s2709_s23, %s1808_s8  ;;  %p1813_p0 = scmp.lt.u32.totalorder %s2709_s23, %s2763_s6 }
 0x39b   : > { %p1814_p1 = scmp.lt.u32.totalorder %s1812_s20, %s1808_s8  ;;  %p1816_p3 = scmp.lt.u32.totalorder %s1808_s8, %s2709_s23 }
 0x39c   : > { %p1810_p12 = pnand %p1809_p11, %p1966_p4 }
 0x39d   : > { %p1815_p2 = por %p1814_p1, %p1813_p0 }
 0x39e   : > { %p1811_p13 = pneg %p1810_p12 }
 0x39f   : > { %p1817_p5 = por %p1816_p3, %p1815_p2 }
 0x3a1   : > { %p1818_p6 = pnand %p1817_p5, %p1811_p13 }
 0x3a3   : > { %1821 = shalt.err (!%p1818_p6)
}
 0x3a4   : > { %s1884_s16 = smov 256   ;;  %s1885_s27 = smov 16  }
 0x3a5   : > { %1698 = dma.vmem_to_hbm [thread:$0]  (%p1966_p4), %s2704_s12, 1024, %s2709_s23, %s1376_s15, %s1884_s16, %s1884_s16, %s1885_s27  }
 0x3a6 PF: > { %p1709_p7 = scmp.ge.s32.totalorder %s1876_s29, 2  ;;  %s1427_s17 = sand.u32 1, %s1856_s24  }
 0x3a7   : > { %s1428_s19 = scalar_lea.sflag [#allocation3], %s1427_s17 }
 0x3a8   : > { %p1703_p9 = pnand %p1709_p7, %p1973_p8 }
 0x3aa   : > { %1847 = dma.done.wait (!%p1703_p9), %s1428_s19, 1024  }
 0x3ab   : > { %1849 = vsyncadd (!%p1703_p9), %s1428_s19, 4294966272  ;;  %s1437_s8 = scalar_lea.sflag [#allocation5], %s1427_s17 }
 0x3ac   : > { %1851 = dma.done.wait (!%p1703_p9), %s1437_s8, 32  }
 0x3ad   : > { %1853 = vsyncadd (!%p1703_p9), %s1437_s8, 4294967264  ;;  %s24_s29 = sadd.s32 1, %s1876_s29   ;;  %s2775_s24 = smov %s1860_s25 }
 0x3ae   : > { %p21_p10 = scmp.ge.s32.totalorder %s24_s29, 4   ;;  %s2776_s25 = smov %s1864_s26 }
 0x3af   : > { %s2777_s26 = smov %s1979_s14  ;;  %s2778_s27 = smov %s1872_s28 }
 0x3b0   : > { %s2779_s28 = smov %s2781_s9  ;;  %23 = sbr.rel (!%p21_p10) target bundleno = 6 (0x6), region = 96 }
 0x3b7   :  { %1442 = vsyncpa [#allocation3], 1 }
 0x3b8   :  { %1444 = vsyncpa [#allocation3 + $0x1], 1 }
 0x3b9   :  { %1445 = vsyncpa [#allocation5], 1 }
 0x3ba   :  { %1447 = vsyncpa [#allocation5 + $0x1], 1 }

</bundles_post_ra>
